<compile_context>
chip_gen: v7x
topology: tpu7x:2x2x1
jax: 0.10.0
libtpu: 0.0.40
codegen_flags: <defaults>
</compile_context>

<pallas_src>
import functools

import jax
import jax.numpy as jnp
from jax.experimental import pallas as pl
from jax.experimental.pallas import tpu as pltpu

N_LAYERS = 12          # 6 encoder + 6 decoder linear layers
NEG_SLOPE = 0.01       # nn.LeakyReLU default negative_slope
LANE = 128


def _leaky_relu(h):
    return jnp.where(h > 0, h, NEG_SLOPE * h)


def _round_up(x, m):
    return (x + m - 1) // m * m


# --------------------------------------------------------------------------- kernel
def autoencoder_kernel(x_ref, w_ref, b_ref, out_ref):
    """x_ref:  (tile, D_pad)          f32
       w_ref:  (12, D_pad, D_pad)     bf16  (pre-transposed: y = x @ W + b)
       b_ref:  (12, 1, D_pad)         f32
       out_ref:(tile, 2*D_pad)        f32   [:, :D_pad]=latent, [:, D_pad:]=recon
    """
    d_pad = w_ref.shape[-1]
    h = x_ref[...]                                     # f32 activations
    for li in range(N_LAYERS):                         # static unrolled loop
        h = jnp.dot(h.astype(jnp.bfloat16), w_ref[li],
                    preferred_element_type=jnp.float32)
        h = h + b_ref[li]                              # (1, D_pad) broadcast, f32
        if li == N_LAYERS // 2 - 1:                    # latent (no activation)
            out_ref[:, :d_pad] = h
        elif li == N_LAYERS - 1:                       # reconstruction (no activation)
            out_ref[:, d_pad:] = h
        else:
            h = _leaky_relu(h)


# --------------------------------------------------------------------------- wrapper
def pack_params(params, d_pad):
    """Pack 12 (W, b) pairs into one padded bf16 weight tensor + one f32 bias tensor."""
    n = len(params)
    w_all = jnp.zeros((n, d_pad, d_pad), jnp.float32)
    b_all = jnp.zeros((n, 1, d_pad), jnp.float32)
    for i, (w, b) in enumerate(params):
        din, dout = w.shape
        w_all = w_all.at[i, :din, :dout].set(w)
        b_all = b_all.at[i, 0, :dout].set(b.reshape(-1))
    return w_all.astype(jnp.bfloat16), b_all


@functools.partial(jax.jit, static_argnames=("input_dim", "latent_dim", "batch_tile"))
def _autoencoder_pallas(x_pad, w_all, b_all, *, input_dim, latent_dim, batch_tile):
    b_pad, d_pad = x_pad.shape
    grid = (b_pad // batch_tile,)

    out = pl.pallas_call(
        autoencoder_kernel,
        out_shape=jax.ShapeDtypeStruct((b_pad, 2 * d_pad), jnp.float32),
        grid_spec=pltpu.PrefetchScalarGridSpec(
            num_scalar_prefetch=0,
            grid=grid,
            in_specs=[
                pl.BlockSpec((batch_tile, d_pad), lambda i: (i, 0)),
                pl.BlockSpec((N_LAYERS, d_pad, d_pad), lambda i: (0, 0, 0)),
                pl.BlockSpec((N_LAYERS, 1, d_pad), lambda i: (0, 0, 0)),
            ],
            out_specs=pl.BlockSpec((batch_tile, 2 * d_pad), lambda i: (i, 0)),
        ),
        compiler_params=pltpu.CompilerParams(
            dimension_semantics=("parallel",),
        ),
    )(x_pad, w_all, b_all)

    latent = out[:, :latent_dim]
    recon = out[:, d_pad:d_pad + input_dim]
    return latent, recon


def autoencoder_forward(x, params, *, batch_tile=256):
    """x: (B, input_dim) f32; params: list of 12 (W, b), W:(in,out), b:(1,out)."""
    assert batch_tile % 8 == 0
    B, input_dim = x.shape
    latent_dim = params[N_LAYERS // 2 - 1][0].shape[1]

    # common padded feature width (lane aligned)
    all_dims = [input_dim] + [w.shape[1] for w, _ in params]
    d_pad = _round_up(max(all_dims), LANE)

    # pad batch and features with zeros (zeros propagate as zeros through padded layers)
    b_pad = _round_up(B, batch_tile)
    x_pad = jnp.zeros((b_pad, d_pad), jnp.float32).at[:B, :input_dim].set(
        x.astype(jnp.float32))

    w_all, b_all = pack_params(params, d_pad)

    latent, recon = _autoencoder_pallas(
        x_pad, w_all, b_all,
        input_dim=input_dim, latent_dim=latent_dim, batch_tile=batch_tile)
    return latent[:B], recon[:B]


# --------------------------------------------------------------------------- params / reference
def init_linear(key, in_dim, out_dim):
    # Mimics PyTorch nn.Linear init (uniform +/- 1/sqrt(in_dim)); W stored (in, out).
    kw, kb = jax.random.split(key)
    bound = 1.0 / jnp.sqrt(jnp.float32(in_dim))
    w = jax.random.uniform(kw, (in_dim, out_dim), jnp.float32, -bound, bound)
    b = jax.random.uniform(kb, (1, out_dim), jnp.float32, -bound, bound)
    return w, b


def build_params(key, dims):
    # dims = [input_dim, h1, h2, h3, h4, h5, latent]
    enc_dims = list(zip(dims[:-1], dims[1:]))
    dec_dims = list(zip(dims[::-1][:-1], dims[::-1][1:]))
    params = []
    keys = jax.random.split(key, len(enc_dims) + len(dec_dims))
    for k, (din, dout) in zip(keys, enc_dims + dec_dims):
        params.append(init_linear(k, din, dout))
    return params


def reference_forward(x, params):
    h = x
    for li, (w, b) in enumerate(params[:6]):
        h = h @ w + b
        if li < 5:
            h = jnp.where(h > 0, h, NEG_SLOPE * h)
    latent = h
    for li, (w, b) in enumerate(params[6:]):
        h = h @ w + b
        if li < 5:
            h = jnp.where(h > 0, h, NEG_SLOPE * h)
    return latent, h


# --------------------------------------------------------------------------- main
if __name__ == "__main__":
    key = jax.random.PRNGKey(0)
    k_x, k_p = jax.random.split(key)

    # Small, forward-consistent sizes:
    # input_dim=64, hidden1=64, hidden2=48, hidden3=32, hidden4=32, hidden5=16, latent=8
    dims = [64, 64, 48, 32, 32, 16, 8]
    batch = 256
    batch_tile = 128   # grid of 2 steps -> both v7x TensorCores get work

    x = jax.random.normal(k_x, (batch, dims[0]), jnp.float32)
    params = build_params(k_p, dims)

    latent, recon = autoencoder_forward(x, params, batch_tile=batch_tile)
    jax.block_until_ready((latent, recon))

    latent_ref, recon_ref = reference_forward(x, params)
    assert latent.shape == (batch, dims[-1]) and recon.shape == (batch, dims[0])
    # bf16 MXU operands with f32 accumulation -> compare against the f32 reference
    # with a correspondingly looser tolerance.
    assert jnp.allclose(latent, latent_ref, atol=5e-2, rtol=5e-2), \
        float(jnp.max(jnp.abs(latent - latent_ref)))
    assert jnp.allclose(recon, recon_ref, atol=5e-2, rtol=5e-2), \
        float(jnp.max(jnp.abs(recon - recon_ref)))

    print("KERNEL_OK")
</pallas_src>

<mosaic_0001>
module attributes {stable_mosaic.version = 11 : i64} {
  func.func @autoencoder_kernel(%arg0: i32, %arg1: memref<128x128xf32, #tpu.memory_space<vmem>>, %arg2: memref<12x128x128xbf16, #tpu.memory_space<vmem>>, %arg3: memref<12x1x128xf32, #tpu.memory_space<vmem>>, %arg4: memref<128x256xf32, #tpu.memory_space<vmem>>) attributes {dimension_semantics = [#tpu.dimension_semantics<parallel>], iteration_bounds = array<i64: 2>, scalar_prefetch = 0 : i64, scratch_operands = 0 : i64, tpu.core_type = #tpu.core_type<tc>, window_params = [{transform_indices = @transform_0, window_bounds = array<i64: 128, 128>}, {pipeline_mode = #tpu.pipeline_mode<synchronous>, transform_indices = @transform_1, window_bounds = array<i64: 12, 128, 128>}, {pipeline_mode = #tpu.pipeline_mode<synchronous>, transform_indices = @transform_2, window_bounds = array<i64: 12, 1, 128>}, {transform_indices = @transform_3, window_bounds = array<i64: 128, 256>}]} {
    %c0 = arith.constant 0 : index
    %c0_0 = arith.constant 0 : index
    %0 = vector.load %arg1[%c0, %c0_0] : memref<128x128xf32, #tpu.memory_space<vmem>>, vector<128x128xf32>
    %1 = arith.truncf %0 : vector<128x128xf32> to vector<128x128xbf16>
    %c0_1 = arith.constant 0 : index
    %c0_2 = arith.constant 0 : index
    %c0_3 = arith.constant 0 : index
    %2 = vector.load %arg2[%c0_1, %c0_2, %c0_3] : memref<12x128x128xbf16, #tpu.memory_space<vmem>>, vector<1x128x128xbf16>
    %3 = vector.shape_cast %2 : vector<1x128x128xbf16> to vector<128x128xbf16>
    %cst = arith.constant dense<0.000000e+00> : vector<128x128xf32>
    %4 = tpu.matmul %1, %3, %cst {dimension_numbers = #tpu.dot_dimension_numbers<[1], [0], [0], [1], [0, 0, 1, 1], [], []>} : vector<128x128xbf16>, vector<128x128xbf16>, vector<128x128xf32> -> vector<128x128xf32>
    %c0_4 = arith.constant 0 : index
    %c0_5 = arith.constant 0 : index
    %c0_6 = arith.constant 0 : index
    %5 = vector.load %arg3[%c0_4, %c0_5, %c0_6] : memref<12x1x128xf32, #tpu.memory_space<vmem>>, vector<1x1x128xf32>
    %6 = vector.shape_cast %5 : vector<1x1x128xf32> to vector<1x128xf32>
    %7 = vector.broadcast %6 : vector<1x128xf32> to vector<128x128xf32>
    %8 = arith.addf %4, %7 : vector<128x128xf32>
    %cst_7 = arith.constant 0.000000e+00 : f32
    %9 = vector.broadcast %cst_7 : f32 to vector<128x128xf32>
    %10 = arith.cmpf ogt, %8, %9 : vector<128x128xf32>
    %cst_8 = arith.constant 0.00999999977 : f32
    %11 = vector.broadcast %cst_8 : f32 to vector<128x128xf32>
    %12 = arith.mulf %11, %8 : vector<128x128xf32>
    %13 = arith.select %10, %8, %12 : vector<128x128xi1>, vector<128x128xf32>
    %14 = arith.truncf %13 : vector<128x128xf32> to vector<128x128xbf16>
    %c1 = arith.constant 1 : index
    %c0_9 = arith.constant 0 : index
    %c0_10 = arith.constant 0 : index
    %15 = vector.load %arg2[%c1, %c0_9, %c0_10] : memref<12x128x128xbf16, #tpu.memory_space<vmem>>, vector<1x128x128xbf16>
    %16 = vector.shape_cast %15 : vector<1x128x128xbf16> to vector<128x128xbf16>
    %cst_11 = arith.constant dense<0.000000e+00> : vector<128x128xf32>
    %17 = tpu.matmul %14, %16, %cst_11 {dimension_numbers = #tpu.dot_dimension_numbers<[1], [0], [0], [1], [0, 0, 1, 1], [], []>} : vector<128x128xbf16>, vector<128x128xbf16>, vector<128x128xf32> -> vector<128x128xf32>
    %c1_12 = arith.constant 1 : index
    %c0_13 = arith.constant 0 : index
    %c0_14 = arith.constant 0 : index
    %18 = vector.load %arg3[%c1_12, %c0_13, %c0_14] : memref<12x1x128xf32, #tpu.memory_space<vmem>>, vector<1x1x128xf32>
    %19 = vector.shape_cast %18 : vector<1x1x128xf32> to vector<1x128xf32>
    %20 = vector.broadcast %19 : vector<1x128xf32> to vector<128x128xf32>
    %21 = arith.addf %17, %20 : vector<128x128xf32>
    %cst_15 = arith.constant 0.000000e+00 : f32
    %22 = vector.broadcast %cst_15 : f32 to vector<128x128xf32>
    %23 = arith.cmpf ogt, %21, %22 : vector<128x128xf32>
    %cst_16 = arith.constant 0.00999999977 : f32
    %24 = vector.broadcast %cst_16 : f32 to vector<128x128xf32>
    %25 = arith.mulf %24, %21 : vector<128x128xf32>
    %26 = arith.select %23, %21, %25 : vector<128x128xi1>, vector<128x128xf32>
    %27 = arith.truncf %26 : vector<128x128xf32> to vector<128x128xbf16>
    %c2 = arith.constant 2 : index
    %c0_17 = arith.constant 0 : index
    %c0_18 = arith.constant 0 : index
    %28 = vector.load %arg2[%c2, %c0_17, %c0_18] : memref<12x128x128xbf16, #tpu.memory_space<vmem>>, vector<1x128x128xbf16>
    %29 = vector.shape_cast %28 : vector<1x128x128xbf16> to vector<128x128xbf16>
    %cst_19 = arith.constant dense<0.000000e+00> : vector<128x128xf32>
    %30 = tpu.matmul %27, %29, %cst_19 {dimension_numbers = #tpu.dot_dimension_numbers<[1], [0], [0], [1], [0, 0, 1, 1], [], []>} : vector<128x128xbf16>, vector<128x128xbf16>, vector<128x128xf32> -> vector<128x128xf32>
    %c2_20 = arith.constant 2 : index
    %c0_21 = arith.constant 0 : index
    %c0_22 = arith.constant 0 : index
    %31 = vector.load %arg3[%c2_20, %c0_21, %c0_22] : memref<12x1x128xf32, #tpu.memory_space<vmem>>, vector<1x1x128xf32>
    %32 = vector.shape_cast %31 : vector<1x1x128xf32> to vector<1x128xf32>
    %33 = vector.broadcast %32 : vector<1x128xf32> to vector<128x128xf32>
    %34 = arith.addf %30, %33 : vector<128x128xf32>
    %cst_23 = arith.constant 0.000000e+00 : f32
    %35 = vector.broadcast %cst_23 : f32 to vector<128x128xf32>
    %36 = arith.cmpf ogt, %34, %35 : vector<128x128xf32>
    %cst_24 = arith.constant 0.00999999977 : f32
    %37 = vector.broadcast %cst_24 : f32 to vector<128x128xf32>
    %38 = arith.mulf %37, %34 : vector<128x128xf32>
    %39 = arith.select %36, %34, %38 : vector<128x128xi1>, vector<128x128xf32>
    %40 = arith.truncf %39 : vector<128x128xf32> to vector<128x128xbf16>
    %c3 = arith.constant 3 : index
    %c0_25 = arith.constant 0 : index
    %c0_26 = arith.constant 0 : index
    %41 = vector.load %arg2[%c3, %c0_25, %c0_26] : memref<12x128x128xbf16, #tpu.memory_space<vmem>>, vector<1x128x128xbf16>
    %42 = vector.shape_cast %41 : vector<1x128x128xbf16> to vector<128x128xbf16>
    %cst_27 = arith.constant dense<0.000000e+00> : vector<128x128xf32>
    %43 = tpu.matmul %40, %42, %cst_27 {dimension_numbers = #tpu.dot_dimension_numbers<[1], [0], [0], [1], [0, 0, 1, 1], [], []>} : vector<128x128xbf16>, vector<128x128xbf16>, vector<128x128xf32> -> vector<128x128xf32>
    %c3_28 = arith.constant 3 : index
    %c0_29 = arith.constant 0 : index
    %c0_30 = arith.constant 0 : index
    %44 = vector.load %arg3[%c3_28, %c0_29, %c0_30] : memref<12x1x128xf32, #tpu.memory_space<vmem>>, vector<1x1x128xf32>
    %45 = vector.shape_cast %44 : vector<1x1x128xf32> to vector<1x128xf32>
    %46 = vector.broadcast %45 : vector<1x128xf32> to vector<128x128xf32>
    %47 = arith.addf %43, %46 : vector<128x128xf32>
    %cst_31 = arith.constant 0.000000e+00 : f32
    %48 = vector.broadcast %cst_31 : f32 to vector<128x128xf32>
    %49 = arith.cmpf ogt, %47, %48 : vector<128x128xf32>
    %cst_32 = arith.constant 0.00999999977 : f32
    %50 = vector.broadcast %cst_32 : f32 to vector<128x128xf32>
    %51 = arith.mulf %50, %47 : vector<128x128xf32>
    %52 = arith.select %49, %47, %51 : vector<128x128xi1>, vector<128x128xf32>
    %53 = arith.truncf %52 : vector<128x128xf32> to vector<128x128xbf16>
    %c4 = arith.constant 4 : index
    %c0_33 = arith.constant 0 : index
    %c0_34 = arith.constant 0 : index
    %54 = vector.load %arg2[%c4, %c0_33, %c0_34] : memref<12x128x128xbf16, #tpu.memory_space<vmem>>, vector<1x128x128xbf16>
    %55 = vector.shape_cast %54 : vector<1x128x128xbf16> to vector<128x128xbf16>
    %cst_35 = arith.constant dense<0.000000e+00> : vector<128x128xf32>
    %56 = tpu.matmul %53, %55, %cst_35 {dimension_numbers = #tpu.dot_dimension_numbers<[1], [0], [0], [1], [0, 0, 1, 1], [], []>} : vector<128x128xbf16>, vector<128x128xbf16>, vector<128x128xf32> -> vector<128x128xf32>
    %c4_36 = arith.constant 4 : index
    %c0_37 = arith.constant 0 : index
    %c0_38 = arith.constant 0 : index
    %57 = vector.load %arg3[%c4_36, %c0_37, %c0_38] : memref<12x1x128xf32, #tpu.memory_space<vmem>>, vector<1x1x128xf32>
    %58 = vector.shape_cast %57 : vector<1x1x128xf32> to vector<1x128xf32>
    %59 = vector.broadcast %58 : vector<1x128xf32> to vector<128x128xf32>
    %60 = arith.addf %56, %59 : vector<128x128xf32>
    %cst_39 = arith.constant 0.000000e+00 : f32
    %61 = vector.broadcast %cst_39 : f32 to vector<128x128xf32>
    %62 = arith.cmpf ogt, %60, %61 : vector<128x128xf32>
    %cst_40 = arith.constant 0.00999999977 : f32
    %63 = vector.broadcast %cst_40 : f32 to vector<128x128xf32>
    %64 = arith.mulf %63, %60 : vector<128x128xf32>
    %65 = arith.select %62, %60, %64 : vector<128x128xi1>, vector<128x128xf32>
    %66 = arith.truncf %65 : vector<128x128xf32> to vector<128x128xbf16>
    %c5 = arith.constant 5 : index
    %c0_41 = arith.constant 0 : index
    %c0_42 = arith.constant 0 : index
    %67 = vector.load %arg2[%c5, %c0_41, %c0_42] : memref<12x128x128xbf16, #tpu.memory_space<vmem>>, vector<1x128x128xbf16>
    %68 = vector.shape_cast %67 : vector<1x128x128xbf16> to vector<128x128xbf16>
    %cst_43 = arith.constant dense<0.000000e+00> : vector<128x128xf32>
    %69 = tpu.matmul %66, %68, %cst_43 {dimension_numbers = #tpu.dot_dimension_numbers<[1], [0], [0], [1], [0, 0, 1, 1], [], []>} : vector<128x128xbf16>, vector<128x128xbf16>, vector<128x128xf32> -> vector<128x128xf32>
    %c5_44 = arith.constant 5 : index
    %c0_45 = arith.constant 0 : index
    %c0_46 = arith.constant 0 : index
    %70 = vector.load %arg3[%c5_44, %c0_45, %c0_46] : memref<12x1x128xf32, #tpu.memory_space<vmem>>, vector<1x1x128xf32>
    %71 = vector.shape_cast %70 : vector<1x1x128xf32> to vector<1x128xf32>
    %72 = vector.broadcast %71 : vector<1x128xf32> to vector<128x128xf32>
    %73 = arith.addf %69, %72 : vector<128x128xf32>
    %c0_47 = arith.constant 0 : index
    %c0_48 = arith.constant 0 : index
    %74 = vector.load %arg4[%c0_47, %c0_48] : memref<128x256xf32, #tpu.memory_space<vmem>>, vector<128x128xf32>
    tpu.vector_store %arg4[%c0_47, %c0_48], %73 {strides = array<i32>} : memref<128x256xf32, #tpu.memory_space<vmem>>, vector<128x128xf32>,
    %75 = arith.truncf %73 : vector<128x128xf32> to vector<128x128xbf16>
    %c6 = arith.constant 6 : index
    %c0_49 = arith.constant 0 : index
    %c0_50 = arith.constant 0 : index
    %76 = vector.load %arg2[%c6, %c0_49, %c0_50] : memref<12x128x128xbf16, #tpu.memory_space<vmem>>, vector<1x128x128xbf16>
    %77 = vector.shape_cast %76 : vector<1x128x128xbf16> to vector<128x128xbf16>
    %cst_51 = arith.constant dense<0.000000e+00> : vector<128x128xf32>
    %78 = tpu.matmul %75, %77, %cst_51 {dimension_numbers = #tpu.dot_dimension_numbers<[1], [0], [0], [1], [0, 0, 1, 1], [], []>} : vector<128x128xbf16>, vector<128x128xbf16>, vector<128x128xf32> -> vector<128x128xf32>
    %c6_52 = arith.constant 6 : index
    %c0_53 = arith.constant 0 : index
    %c0_54 = arith.constant 0 : index
    %79 = vector.load %arg3[%c6_52, %c0_53, %c0_54] : memref<12x1x128xf32, #tpu.memory_space<vmem>>, vector<1x1x128xf32>
    %80 = vector.shape_cast %79 : vector<1x1x128xf32> to vector<1x128xf32>
    %81 = vector.broadcast %80 : vector<1x128xf32> to vector<128x128xf32>
    %82 = arith.addf %78, %81 : vector<128x128xf32>
    %cst_55 = arith.constant 0.000000e+00 : f32
    %83 = vector.broadcast %cst_55 : f32 to vector<128x128xf32>
    %84 = arith.cmpf ogt, %82, %83 : vector<128x128xf32>
    %cst_56 = arith.constant 0.00999999977 : f32
    %85 = vector.broadcast %cst_56 : f32 to vector<128x128xf32>
    %86 = arith.mulf %85, %82 : vector<128x128xf32>
    %87 = arith.select %84, %82, %86 : vector<128x128xi1>, vector<128x128xf32>
    %88 = arith.truncf %87 : vector<128x128xf32> to vector<128x128xbf16>
    %c7 = arith.constant 7 : index
    %c0_57 = arith.constant 0 : index
    %c0_58 = arith.constant 0 : index
    %89 = vector.load %arg2[%c7, %c0_57, %c0_58] : memref<12x128x128xbf16, #tpu.memory_space<vmem>>, vector<1x128x128xbf16>
    %90 = vector.shape_cast %89 : vector<1x128x128xbf16> to vector<128x128xbf16>
    %cst_59 = arith.constant dense<0.000000e+00> : vector<128x128xf32>
    %91 = tpu.matmul %88, %90, %cst_59 {dimension_numbers = #tpu.dot_dimension_numbers<[1], [0], [0], [1], [0, 0, 1, 1], [], []>} : vector<128x128xbf16>, vector<128x128xbf16>, vector<128x128xf32> -> vector<128x128xf32>
    %c7_60 = arith.constant 7 : index
    %c0_61 = arith.constant 0 : index
    %c0_62 = arith.constant 0 : index
    %92 = vector.load %arg3[%c7_60, %c0_61, %c0_62] : memref<12x1x128xf32, #tpu.memory_space<vmem>>, vector<1x1x128xf32>
    %93 = vector.shape_cast %92 : vector<1x1x128xf32> to vector<1x128xf32>
    %94 = vector.broadcast %93 : vector<1x128xf32> to vector<128x128xf32>
    %95 = arith.addf %91, %94 : vector<128x128xf32>
    %cst_63 = arith.constant 0.000000e+00 : f32
    %96 = vector.broadcast %cst_63 : f32 to vector<128x128xf32>
    %97 = arith.cmpf ogt, %95, %96 : vector<128x128xf32>
    %cst_64 = arith.constant 0.00999999977 : f32
    %98 = vector.broadcast %cst_64 : f32 to vector<128x128xf32>
    %99 = arith.mulf %98, %95 : vector<128x128xf32>
    %100 = arith.select %97, %95, %99 : vector<128x128xi1>, vector<128x128xf32>
    %101 = arith.truncf %100 : vector<128x128xf32> to vector<128x128xbf16>
    %c8 = arith.constant 8 : index
    %c0_65 = arith.constant 0 : index
    %c0_66 = arith.constant 0 : index
    %102 = vector.load %arg2[%c8, %c0_65, %c0_66] : memref<12x128x128xbf16, #tpu.memory_space<vmem>>, vector<1x128x128xbf16>
    %103 = vector.shape_cast %102 : vector<1x128x128xbf16> to vector<128x128xbf16>
    %cst_67 = arith.constant dense<0.000000e+00> : vector<128x128xf32>
    %104 = tpu.matmul %101, %103, %cst_67 {dimension_numbers = #tpu.dot_dimension_numbers<[1], [0], [0], [1], [0, 0, 1, 1], [], []>} : vector<128x128xbf16>, vector<128x128xbf16>, vector<128x128xf32> -> vector<128x128xf32>
    %c8_68 = arith.constant 8 : index
    %c0_69 = arith.constant 0 : index
    %c0_70 = arith.constant 0 : index
    %105 = vector.load %arg3[%c8_68, %c0_69, %c0_70] : memref<12x1x128xf32, #tpu.memory_space<vmem>>, vector<1x1x128xf32>
    %106 = vector.shape_cast %105 : vector<1x1x128xf32> to vector<1x128xf32>
    %107 = vector.broadcast %106 : vector<1x128xf32> to vector<128x128xf32>
    %108 = arith.addf %104, %107 : vector<128x128xf32>
    %cst_71 = arith.constant 0.000000e+00 : f32
    %109 = vector.broadcast %cst_71 : f32 to vector<128x128xf32>
    %110 = arith.cmpf ogt, %108, %109 : vector<128x128xf32>
    %cst_72 = arith.constant 0.00999999977 : f32
    %111 = vector.broadcast %cst_72 : f32 to vector<128x128xf32>
    %112 = arith.mulf %111, %108 : vector<128x128xf32>
    %113 = arith.select %110, %108, %112 : vector<128x128xi1>, vector<128x128xf32>
    %114 = arith.truncf %113 : vector<128x128xf32> to vector<128x128xbf16>
    %c9 = arith.constant 9 : index
    %c0_73 = arith.constant 0 : index
    %c0_74 = arith.constant 0 : index
    %115 = vector.load %arg2[%c9, %c0_73, %c0_74] : memref<12x128x128xbf16, #tpu.memory_space<vmem>>, vector<1x128x128xbf16>
    %116 = vector.shape_cast %115 : vector<1x128x128xbf16> to vector<128x128xbf16>
    %cst_75 = arith.constant dense<0.000000e+00> : vector<128x128xf32>
    %117 = tpu.matmul %114, %116, %cst_75 {dimension_numbers = #tpu.dot_dimension_numbers<[1], [0], [0], [1], [0, 0, 1, 1], [], []>} : vector<128x128xbf16>, vector<128x128xbf16>, vector<128x128xf32> -> vector<128x128xf32>
    %c9_76 = arith.constant 9 : index
    %c0_77 = arith.constant 0 : index
    %c0_78 = arith.constant 0 : index
    %118 = vector.load %arg3[%c9_76, %c0_77, %c0_78] : memref<12x1x128xf32, #tpu.memory_space<vmem>>, vector<1x1x128xf32>
    %119 = vector.shape_cast %118 : vector<1x1x128xf32> to vector<1x128xf32>
    %120 = vector.broadcast %119 : vector<1x128xf32> to vector<128x128xf32>
    %121 = arith.addf %117, %120 : vector<128x128xf32>
    %cst_79 = arith.constant 0.000000e+00 : f32
    %122 = vector.broadcast %cst_79 : f32 to vector<128x128xf32>
    %123 = arith.cmpf ogt, %121, %122 : vector<128x128xf32>
    %cst_80 = arith.constant 0.00999999977 : f32
    %124 = vector.broadcast %cst_80 : f32 to vector<128x128xf32>
    %125 = arith.mulf %124, %121 : vector<128x128xf32>
    %126 = arith.select %123, %121, %125 : vector<128x128xi1>, vector<128x128xf32>
    %127 = arith.truncf %126 : vector<128x128xf32> to vector<128x128xbf16>
    %c10 = arith.constant 10 : index
    %c0_81 = arith.constant 0 : index
    %c0_82 = arith.constant 0 : index
    %128 = vector.load %arg2[%c10, %c0_81, %c0_82] : memref<12x128x128xbf16, #tpu.memory_space<vmem>>, vector<1x128x128xbf16>
    %129 = vector.shape_cast %128 : vector<1x128x128xbf16> to vector<128x128xbf16>
    %cst_83 = arith.constant dense<0.000000e+00> : vector<128x128xf32>
    %130 = tpu.matmul %127, %129, %cst_83 {dimension_numbers = #tpu.dot_dimension_numbers<[1], [0], [0], [1], [0, 0, 1, 1], [], []>} : vector<128x128xbf16>, vector<128x128xbf16>, vector<128x128xf32> -> vector<128x128xf32>
    %c10_84 = arith.constant 10 : index
    %c0_85 = arith.constant 0 : index
    %c0_86 = arith.constant 0 : index
    %131 = vector.load %arg3[%c10_84, %c0_85, %c0_86] : memref<12x1x128xf32, #tpu.memory_space<vmem>>, vector<1x1x128xf32>
    %132 = vector.shape_cast %131 : vector<1x1x128xf32> to vector<1x128xf32>
    %133 = vector.broadcast %132 : vector<1x128xf32> to vector<128x128xf32>
    %134 = arith.addf %130, %133 : vector<128x128xf32>
    %cst_87 = arith.constant 0.000000e+00 : f32
    %135 = vector.broadcast %cst_87 : f32 to vector<128x128xf32>
    %136 = arith.cmpf ogt, %134, %135 : vector<128x128xf32>
    %cst_88 = arith.constant 0.00999999977 : f32
    %137 = vector.broadcast %cst_88 : f32 to vector<128x128xf32>
    %138 = arith.mulf %137, %134 : vector<128x128xf32>
    %139 = arith.select %136, %134, %138 : vector<128x128xi1>, vector<128x128xf32>
    %140 = arith.truncf %139 : vector<128x128xf32> to vector<128x128xbf16>
    %c11 = arith.constant 11 : index
    %c0_89 = arith.constant 0 : index
    %c0_90 = arith.constant 0 : index
    %141 = vector.load %arg2[%c11, %c0_89, %c0_90] : memref<12x128x128xbf16, #tpu.memory_space<vmem>>, vector<1x128x128xbf16>
    %142 = vector.shape_cast %141 : vector<1x128x128xbf16> to vector<128x128xbf16>
    %cst_91 = arith.constant dense<0.000000e+00> : vector<128x128xf32>
    %143 = tpu.matmul %140, %142, %cst_91 {dimension_numbers = #tpu.dot_dimension_numbers<[1], [0], [0], [1], [0, 0, 1, 1], [], []>} : vector<128x128xbf16>, vector<128x128xbf16>, vector<128x128xf32> -> vector<128x128xf32>
    %c11_92 = arith.constant 11 : index
    %c0_93 = arith.constant 0 : index
    %c0_94 = arith.constant 0 : index
    %144 = vector.load %arg3[%c11_92, %c0_93, %c0_94] : memref<12x1x128xf32, #tpu.memory_space<vmem>>, vector<1x1x128xf32>
    %145 = vector.shape_cast %144 : vector<1x1x128xf32> to vector<1x128xf32>
    %146 = vector.broadcast %145 : vector<1x128xf32> to vector<128x128xf32>
    %147 = arith.addf %143, %146 : vector<128x128xf32>
    %c0_95 = arith.constant 0 : index
    %c128 = arith.constant 128 : index
    %148 = vector.load %arg4[%c0_95, %c128] : memref<128x256xf32, #tpu.memory_space<vmem>>, vector<128x128xf32>
    tpu.vector_store %arg4[%c0_95, %c128], %147 {strides = array<i32>} : memref<128x256xf32, #tpu.memory_space<vmem>>, vector<128x128xf32>,
    return
  }
  func.func @transform_0(%arg0: i32) -> (i32, i32) {
    %c0_i32 = arith.constant 0 : i32
    %c0_i32_0 = arith.constant 0 : i32
    return %arg0, %c0_i32 : i32, i32
  }
  func.func @transform_1(%arg0: i32) -> (i32, i32, i32) {
    %c0_i32 = arith.constant 0 : i32
    %c0_i32_0 = arith.constant 0 : i32
    %c0_i32_1 = arith.constant 0 : i32
    %c0_i32_2 = arith.constant 0 : i32
    return %c0_i32, %c0_i32_0, %c0_i32_1 : i32, i32, i32
  }
  func.func @transform_2(%arg0: i32) -> (i32, i32, i32) {
    %c0_i32 = arith.constant 0 : i32
    %c0_i32_0 = arith.constant 0 : i32
    %c0_i32_1 = arith.constant 0 : i32
    %c0_i32_2 = arith.constant 0 : i32
    return %c0_i32, %c0_i32_0, %c0_i32_1 : i32, i32, i32
  }
  func.func @transform_3(%arg0: i32) -> (i32, i32) {
    %c0_i32 = arith.constant 0 : i32
    %c0_i32_0 = arith.constant 0 : i32
    return %arg0, %c0_i32 : i32, i32
  }
}

</mosaic_0001>

<bundles_post_ra>
// kernel: _autoencoder_pallas.1
= control target key start
LH: loop header
LB: loop body
LE: loop exit
PB: predicated region body
PF: predicated region fallthrough
CT: control target
= control target key end

     0   :  { %8 = vsyncpa [#allocation3], 0  ;;  %s4406_s0 = inlined_call_operand.hbm [shape: f32[256,128], index: 0, kind: input, shape index: {}]   ;;  %s4407_s1 = inlined_call_operand.hbm [shape: bf16[12,128,128], index: 1, kind: input, shape index: {}]   ;;  %s4408_s2 = inlined_call_operand.hbm [shape: f32[12,1,128], index: 2, kind: input, shape index: {}]   ;;  %s4409_s3 = inlined_call_operand.vmem [shape: f32[256,256], index: 3, kind: output, shape index: {}]  }
   0x1   :  { %10 = vsyncpa [#allocation3 + $0x1], 0 }
   0x2   :  { %11 = vsyncpa [#allocation5], 0  ;;  %s3996_s12 = smov 0   ;;  %s3998_s13 = smov 0  }
   0x3   :  { %s4000_s14 = smov 0   ;;  %s4002_s15 = smov 0  }
   0x4 LB: > { %s2975_s16 = sadd.s32 4294967295, %s3965_s15   ;;  %p37_p0 = scmp.ne.s32.totalorder %s3957_s13, %s3953_s12  ;;  %s3965_s15 = sphi %s4002_s15, %s4425_s15   ;;  %s3961_s14 = sphi %s4000_s14, %s4424_s14   ;;  %s3957_s13 = sphi %s3998_s13, %s4423_s13   ;;  %s3953_s12 = sphi %s3996_s12, %s4422_s12  }
   0x5   : > { %p4018_p1 = scmp.eq.s32.totalorder %s2975_s16, 0  ;;  %p2977_p2 = scmp.ge.s32.totalorder %s3965_s15, 1 }
   0x6   : > { %p116_p3 = scmp.lt.s32.totalorder %s3965_s15, 3  ;;  %s3967_s20 = smov [#allocation4]  }
   0x7   : > { %s4414_s17 = scalar_select %p4018_p1, 1, 0 }
   0x8   : > { %p4026_p4 = por %p4018_p1, %p37_p0  ;;  %p4030_p5 = pnand %p2977_p2, %p116_p3 }
   0x9   : > { %s128_s21 = sshll.u32 %s3967_s20, 4  ;;  %s3968_s23 = smov [#allocation6]   ;;  %s129_s21 = int_to_ptr.vmem [resolvable:$true] %s128_s21 }
   0xa   : > { %s4415_s18 = scalar_select %p4026_p4, 1, 0 }
   0xb   : > { %s4416_s19 = scalar_select %p4030_p5, 1, 0 }
   0xc   : > { %p3689_p6 = pneg %p4030_p5  ;;  %s141_s24 = sshll.u32 %s3968_s23, 4  ;;  %s4042_s24 = int_to_ptr.vmem [resolvable:$true] %s141_s24 }
   0xd   : > { %s3841_s27 = scalar_lea.hbm %s4407_s1, 12288 }
   0xe   : > { %p4038_p7 = pnand %p3689_p6, %p4018_p1  ;;  %p3842_p8 = scmp.ne.s32.totalorder %s4407_s1, %s3841_s27 }
   0xf   : > { %p3848_p12 = scmp.lt.u32.totalorder %s3841_s27, %s4407_s1 }
  0x10   : > { %p3843_p9 = pneg %p4038_p7 }
  0x12   : > { %p3844_p10 = pnand %p3843_p9, %p3842_p8 }
  0x14   : > { %p3845_p11 = pneg %p3844_p10 }
  0x16   : > { %p3850_p13 = pnand %p3848_p12, %p3845_p11 }
  0x18   : > { %3853 = shalt.err (!%p3850_p13)
}
  0x19   : > { %s3854_s5 = scalar_lea.vmem %s129_s21, 12288  ;;  %p3862_p6 = scmp.lt.s32.totalorder %s129_s21, %s129_s21 }
  0x1a   : > { %p3855_p0 = scmp.ne.s32.totalorder %s129_s21, %s3854_s5  ;;  %p3863_p1 = scmp.lt.s32.totalorder %s3854_s5, %s3854_s5 }
  0x1c   : > { %p3857_p2 = pnand %p3855_p0, %p3843_p9  ;;  %p3864_p4 = por %p3863_p1, %p3862_p6 }
  0x1e   : > { %p3858_p3 = pneg %p3857_p2 }
  0x20   : > { %p3865_p5 = pnand %p3864_p4, %p3858_p3 }
  0x22   : > { %3868 = shalt.err (!%p3865_p5)
}
  0x23   : > { %s3969_s6 = smov 64   ;;  %s3970_s7 = smov 4  }
  0x24   : > { %3692 = dma.hbm_to_vmem [thread:$0]  (!%p4038_p7), %s4407_s1, 12288, %s129_s21, [#allocation5], %s3969_s6, %s3969_s6, %s3970_s7  }
  0x25   : > { %s3869_s12 = scalar_lea.hbm %s4408_s2, 192 }
  0x26   : > { %p3870_p8 = scmp.ne.s32.totalorder %s4408_s2, %s3869_s12  ;;  %p3876_p5 = scmp.lt.u32.totalorder %s3869_s12, %s4408_s2 }
  0x28   : > { %p3872_p1 = pnand %p3870_p8, %p3843_p9 }
  0x2a   : > { %p3873_p4 = pneg %p3872_p1 }
  0x2c   : > { %p3878_p10 = pnand %p3876_p5, %p3873_p4 }
  0x2e   : > { %3881 = shalt.err (!%p3878_p10)
}
  0x2f   : > { %s3882_s21 = scalar_lea.vmem %s4042_s24, 192  ;;  %p3890_p0 = scmp.lt.s32.totalorder %s4042_s24, %s4042_s24 }
  0x30   : > { %p3883_p11 = scmp.ne.s32.totalorder %s4042_s24, %s3882_s21  ;;  %p3891_p2 = scmp.lt.s32.totalorder %s3882_s21, %s3882_s21 }
  0x32   : > { %p3885_p12 = pnand %p3883_p11, %p3843_p9  ;;  %p3892_p3 = por %p3891_p2, %p3890_p0 }
  0x34   : > { %p3886_p13 = pneg %p3885_p12 }
  0x36   : > { %p3893_p6 = pnand %p3892_p3, %p3886_p13 }
  0x38   : > { %3896 = shalt.err (!%p3893_p6)
}
  0x39   : > { %s3971_s27 = smov 16   ;;  %s3972_s28 = smov 1  }
  0x3a   : > { %3695 = dma.hbm_to_vmem [thread:$0]  (!%p4038_p7), %s4408_s2, 192, %s4042_s24, [#allocation5], %s3971_s27, %s3971_s27, %s3972_s28  }
  0x3b   : > { %s4092_s4 = sadd.s32 1, %s3965_s15   ;;  %s24_s6 = sadd.s32 1, %s3961_s14 }
  0x3c   : > { %s21_s5 = ssub.s32 %s3965_s15, %s4092_s4  ;;  %p31_p8 = scmp.ne.s32.totalorder %s3961_s14, %s3957_s13 }
  0x3d   : > { %p22_p9 = scmp.eq.s32.totalorder %s21_s5, 0  ;;  %p32_p1 = scmp.eq.s32.totalorder %s3965_s15, 0 }
  0x3e   : > { %p3702_p5 = scmp.lt.s32.totalorder %s3965_s15, 2  ;;  %s155_s8 = sand.u32 1, %s3961_s14  }
  0x3f   : > { %s4101_s7 = scalar_select %p22_p9, %s3961_s14, %s24_s6  }
  0x40   : > { %p33_p4 = por %p32_p1, %p31_p8  ;;  %s3101_s9 = sshll.u32 %s3965_s15, 11 }
  0x41   : > { %s2981_s10 = sshll.u32 %s155_s8, 7  ;;  %s4109_s12 = scalar_lea.hbm %s4406_s0, %s3101_s9 }
  0x42   : > { %s159_s24 = scalar_lea.vmem [#allocation2], %s2981_s10  ;;  %p4111_p7 = pnand %p3702_p5, %p33_p4 }
  0x43   : > { %s166_s20 = sshll.u32 %s159_s24, 4  ;;  %s4117_s25 = scalar_lea.sflag [#allocation3], %s155_s8  ;;  %s4115_s20 = int_to_ptr.vmem [resolvable:$true] %s166_s20 }
  0x44   : > { %s3897_s26 = scalar_lea.hbm %s4109_s12, 2048  ;;  %p3899_p11 = pneg %p4111_p7 }
  0x45   : > { %p3898_p10 = scmp.ne.s32.totalorder %s4109_s12, %s3897_s26  ;;  %s3902_s28 = scalar_lea.hbm %s4406_s0, 4096 }
  0x46   : > { %p3903_p0 = scmp.lt.u32.totalorder %s4109_s12, %s4406_s0  ;;  %p3904_p2 = scmp.lt.u32.totalorder %s3902_s28, %s3897_s26 }
  0x47   : > { %p3900_p12 = pnand %p3899_p11, %p3898_p10  ;;  %p3906_p6 = scmp.lt.u32.totalorder %s3897_s26, %s4109_s12 }
  0x48   : > { %p3905_p3 = por %p3904_p2, %p3903_p0 }
  0x49   : > { %p3901_p13 = pneg %p3900_p12 }
  0x4a   : > { %p3907_p9 = por %p3906_p6, %p3905_p3 }
  0x4c   : > { %p3908_p8 = pnand %p3907_p9, %p3901_p13 }
  0x4e   : > { %3911 = shalt.err (!%p3908_p8)
}
  0x4f   : > { %s3912_s5 = scalar_lea.vmem %s4115_s20, 2048  ;;  %s3973_s6 = smov [#allocation2]  }
  0x50   : > { %p3913_p1 = scmp.ne.s32.totalorder %s4115_s20, %s3912_s5  ;;  %s3917_s8 = sshll.u32 %s3973_s6, 4  ;;  %s3918_s8 = int_to_ptr.vmem [resolvable:$false] %s3917_s8 }
  0x51   : > { %s3919_s9 = scalar_lea.vmem %s3918_s8, 4096  ;;  %p3920_p10 = scmp.lt.s32.totalorder %s4115_s20, %s3918_s8 }
  0x52   : > { %p3915_p4 = pnand %p3913_p1, %p3899_p11  ;;  %p3921_p12 = scmp.lt.s32.totalorder %s3919_s9, %s3912_s5 }
  0x54   : > { %p3916_p5 = pneg %p3915_p4  ;;  %p3922_p0 = por %p3921_p12, %p3920_p10 }
  0x56   : > { %p3923_p2 = pnand %p3922_p0, %p3916_p5 }
  0x58   : > { %3926 = shalt.err (!%p3923_p2)
}
  0x59   : > { %s3974_s10 = smov 128   ;;  %s3975_s22 = smov 8  }
  0x5a   : > { %3699 = dma.hbm_to_vmem [thread:$0]  (!%p4111_p7), %s4109_s12, 2048, %s4115_s20, %s4117_s25, %s3974_s10, %s3974_s10, %s3975_s22  }
  0x5b   : > { %p4419_p11 = scmp.ne.s32.totalorder %s4416_s19, 0 }
  0x5c   : > { %s180_s11 = sand.u32 (!%p4419_p11), 1, %s3957_s13   ;;  %p4420_p13 = scmp.ne.s32.totalorder (!%p4419_p11), %s4415_s18, 0 }
  0x5d   : > { %178 = sbr.rel (%p4419_p11) target bundleno = 2829 (0xb0d), region = 32  ;;  %s2985_s24 = sshll.u32 (!%p4419_p11), %s180_s11, 7 }
  0x5e   : > { %s181_s26 = scalar_lea.sflag (!%p4419_p11), [#allocation3], %s180_s11  ;;  %s4148_s21 = scalar_lea.vmem (!%p4419_p11), [#allocation2], %s2985_s24 }
  0x64   : > { %3944 = dma.done.wait (%p4420_p13), %s181_s26, 2048  }
  0x65   : > { %3946 = vsyncadd (%p4420_p13), %s181_s26, 4294965248  ;;  %p4421_p3 = scmp.ne.s32.totalorder %s4414_s17, 0 }
  0x67   : > { %3948 = dma.done.wait (%p4421_p3), [#allocation5], 12480  }
  0x68   : > { %3950 = vsyncadd (%p4421_p3), [#allocation5], 4294954816  ;;  %v3745_v0 = vld [vmem:[#allocation4] sm:$0xff]   ;;  %v3746_v1 = vld [vmem:[#allocation4 + $0x8] sm:$0xff]   ;;  %s2988_s17 = sshll.u32 %s2975_s16, 4 }
  0x69   : > { %3295 = vmatprep.subr.bf16.mxu0 %v3745_v0  ;;  %v3747_v2 = vld [vmem:[#allocation4 + $0x10] sm:$0xff]   ;;  %v3748_v3 = vld [vmem:[#allocation4 + $0x18] sm:$0xff]   ;;  %v225_v4 = vld [vmem:[%s4148_s21] sm:$0xff]  ;;  %p218_p7 = scmp.lt.s32.totalorder %s2988_s17, 31 }
  0x6a   : > { %3296 = vmatpush3.bf16.msra.mxu0 %v3745_v0  ;;  %v226_v5 = vld [vmem:[%s4148_s21 + $0x8] sm:$0xff]  ;;  %v3749_v7 = vld [vmem:[#allocation4 + $0x20] sm:$0xff]   ;;  %v3751_v11 = vld [vmem:[#allocation4 + $0x30] sm:$0xff]  }
  0x6b   : > { %3297 = vmatprep.subr.bf16.mxu0 %v3746_v1  ;;  %v241_v6 = vpack.c.bf16 %v226_v5, %v225_v4  ;;  %v3753_v8 = vld [vmem:[#allocation4 + $0x40] sm:$0xff]   ;;  %v3754_v9 = vld [vmem:[#allocation4 + $0x48] sm:$0xff]   ;;  %v3755_v12 = vld [vmem:[#allocation4 + $0x50] sm:$0xff]   ;;  %s4427_s17 = smov (!%p218_p7, %s2988_s17), 31 }
  0x6c   : > { %v3750_v10 = vld [vmem:[#allocation4 + $0x28] sm:$0xff]   ;;  %3327 = vmatprep.subr.bf16.mxu1 %v3753_v8  ;;  %v3756_v13 = vld [vmem:[#allocation4 + $0x58] sm:$0xff]   ;;  %v3757_v15 = vld [vmem:[#allocation4 + $0x60] sm:$0xff]   ;;  %s3102_s18 = sshll.u32 %s4427_s17, 4 }
  0x6d   : > { %3311 = vmatprep.mubr.bf16.mxu0 %v241_v6  ;;  %3328 = vmatpush3.bf16.msra.mxu1 %v3753_v8  ;;  %v3752_v14 = vld [vmem:[#allocation4 + $0x38] sm:$0xff]   ;;  %v227_v16 = vld [vmem:[%s4148_s21 + $0x10] sm:$0xff]  ;;  %v229_v18 = vld [vmem:[%s4148_s21 + $0x20] sm:$0xff]  ;;  %s4269_s20 = scalar_lea.vmem %s4409_s3, %s3102_s18 }
  0x6e   : > { %3298 = vmatpush3.bf16.msra.mxu0 %v3746_v1  ;;  %3329 = vmatprep.subr.bf16.mxu1 %v3754_v9  ;;  %v228_v17 = vld [vmem:[%s4148_s21 + $0x18] sm:$0xff]  ;;  %v230_v19 = vld [vmem:[%s4148_s21 + $0x28] sm:$0xff]  ;;  %v231_v22 = vld [vmem:[%s4148_s21 + $0x30] sm:$0xff] }
  0x6f   : > { %3299 = vmatprep.subr.bf16.mxu0 %v3747_v2  ;;  %v242_v20 = vpack.c.bf16 %v228_v17, %v227_v16  ;;  %v243_v21 = vpack.c.bf16 %v230_v19, %v229_v18  ;;  %v232_v23 = vld [vmem:[%s4148_s21 + $0x38] sm:$0xff]  ;;  %v233_v24 = vld [vmem:[%s4148_s21 + $0x40] sm:$0xff]  ;;  %v234_v25 = vld [vmem:[%s4148_s21 + $0x48] sm:$0xff] }
  0x70   : > { %v244_v26 = vpack.c.bf16 %v232_v23, %v231_v22  ;;  %v245_v27 = vpack.c.bf16 %v234_v25, %v233_v24  ;;  %v235_v28 = vld [vmem:[%s4148_s21 + $0x50] sm:$0xff]  ;;  %v236_v29 = vld [vmem:[%s4148_s21 + $0x58] sm:$0xff]  ;;  %v237_v30 = vld [vmem:[%s4148_s21 + $0x60] sm:$0xff] }
  0x71   : > { %3330 = vmatpush3.bf16.msra.mxu1 %v3754_v9  ;;  %v238_v31 = vld [vmem:[%s4148_s21 + $0x68] sm:$0xff]  ;;  %v246_v32 = vpack.c.bf16 %v236_v29, %v235_v28  ;;  %v239_v34 = vld [vmem:[%s4148_s21 + $0x70] sm:$0xff]  ;;  %v240_v35 = vld [vmem:[%s4148_s21 + $0x78] sm:$0xff] }
  0x72   : > { %3300 = vmatpush3.bf16.msra.mxu0 %v3747_v2  ;;  %3331 = vmatprep.subr.bf16.mxu1 %v3755_v12  ;;  %v247_v33 = vpack.c.bf16 %v238_v31, %v237_v30  ;;  %v248_v36 = vpack.c.bf16 %v240_v35, %v239_v34  ;;  %v3758_v37 = vld [vmem:[#allocation4 + $0x68] sm:$0xff]   ;;  %v3759_v38 = vld [vmem:[#allocation4 + $0x70] sm:$0xff]   ;;  %v3760_v39 = vld [vmem:[#allocation4 + $0x78] sm:$0xff]  }
  0x73   : > { %3301 = vmatprep.subr.bf16.mxu0 %v3748_v3  ;;  %v3761_v40 = vld [vmem:[#allocation4 + $0x80] sm:$0xff]   ;;  %v3762_v41 = vld [vmem:[#allocation4 + $0x88] sm:$0xff]   ;;  %v3763_v42 = vld [vmem:[#allocation4 + $0x90] sm:$0xff]  }
  0x74   : > { %v3764_v43 = vld [vmem:[#allocation4 + $0x98] sm:$0xff]   ;;  %v3765_v44 = vld [vmem:[#allocation4 + $0xa0] sm:$0xff]   ;;  %v3766_v45 = vld [vmem:[#allocation4 + $0xa8] sm:$0xff]  }
  0x75   : > { %3332 = vmatpush3.bf16.msra.mxu1 %v3755_v12  ;;  %v4174_v46 = vld [vmem:[#allocation6] ss:$0 sm:$0xff] }
  0x76   : > { %3302 = vmatpush3.bf16.msra.mxu0 %v3748_v3  ;;  %3333 = vmatprep.subr.bf16.mxu1 %v3756_v13 }
  0x77   : > { %3303 = vmatprep.subr.bf16.mxu0 %v3749_v7 }
  0x79   : > { %3334 = vmatpush3.bf16.msra.mxu1 %v3756_v13 }
  0x7a   : > { %3304 = vmatpush3.bf16.msra.mxu0 %v3749_v7  ;;  %3335 = vmatprep.subr.bf16.mxu1 %v3757_v15 }
  0x7b   : > { %3305 = vmatprep.subr.bf16.mxu0 %v3750_v10 }
  0x7d   : > { %3336 = vmatpush3.bf16.msra.mxu1 %v3757_v15 }
  0x7e   : > { %3306 = vmatpush3.bf16.msra.mxu0 %v3750_v10  ;;  %3337 = vmatprep.subr.bf16.mxu1 %v3758_v37 }
  0x7f   : > { %3307 = vmatprep.subr.bf16.mxu0 %v3751_v11 }
  0x81   : > { %3338 = vmatpush3.bf16.msra.mxu1 %v3758_v37 }
  0x82   : > { %3308 = vmatpush3.bf16.msra.mxu0 %v3751_v11  ;;  %3339 = vmatprep.subr.bf16.mxu1 %v3759_v38 }
  0x83   : > { %3309 = vmatprep.subr.bf16.mxu0 %v3752_v14 }
  0x85   : > { %3340 = vmatpush3.bf16.msra.mxu1 %v3759_v38 }
  0x86   : > { %3310 = vmatpush3.bf16.msra.mxu0 %v3752_v14  ;;  %3341 = vmatprep.subr.bf16.mxu1 %v3760_v39 }
  0x87   : > { %3359 = vmatprep.subr.bf16.mxu0 %v3761_v40 }
  0x89   : > { %3312 = vmatmul.mubr.bf16.vlgmr.msra.gmra.mrb[0].mxu0 %v242_v20  ;;  %3342 = vmatpush3.bf16.msra.mxu1 %v3760_v39 }
  0x8a   : > { %3315 = vmatprep.mubr.bf16.mxu0 %v243_v21  ;;  %3360 = vmatpush3.bf16.msra.mxu0 %v3761_v40 }
  0x8b   : > { %3361 = vmatprep.subr.bf16.mxu0 %v3762_v41 }
  0x8e   : > { %3362 = vmatpush3.bf16.msra.mxu0 %v3762_v41 }
  0x8f   : > { %3363 = vmatprep.subr.bf16.mxu0 %v3763_v42 }
  0x91   : > { %3316 = vmatmul.mubr.bf16.gmra.mrb[4].mxu0 %v244_v26 }
  0x92   : > { %3319 = vmatprep.mubr.bf16.mxu0 %v245_v27  ;;  %3364 = vmatpush3.bf16.msra.mxu0 %v3763_v42 }
  0x93   : > { %3365 = vmatprep.subr.bf16.mxu0 %v3764_v43 }
  0x96   : > { %3366 = vmatpush3.bf16.msra.mxu0 %v3764_v43 }
  0x97   : > { %3367 = vmatprep.subr.bf16.mxu0 %v3765_v44 }
  0x99   : > { %3320 = vmatmul.mubr.bf16.gmra.mrb[8].mxu0 %v246_v32 }
  0x9a   : > { %3323 = vmatprep.mubr.bf16.mxu0 %v247_v33  ;;  %3368 = vmatpush3.bf16.msra.mxu0 %v3765_v44 }
  0x9b   : > { %3369 = vmatprep.subr.bf16.mxu0 %v3766_v45 }
  0x9e   : > { %3370 = vmatpush3.bf16.msra.mxu0 %v3766_v45 }
  0xa1   : > { %3324 = vmatmul.mubr.bf16.gmra.mrb[12].mxu0 %v248_v36 }
 0x15c   : > { %v3313_v47 = vpop.f32.mrb[0].mxu0 }
 0x15d   : > { %v363_v48 = vadd.f32 %v3313_v47, %v4174_v46  ;;  %v354_v49 = vpop.f32.mrb[1].mxu0 }
 0x15e   : > { %v355_v50 = vadd.f32 %v4174_v46, %v354_v49  ;;  %v3314_v51 = vpop.f32.mrb[2].mxu0 }
 0x15f   : > { %v435_v52 = vmul.f32 0.01, %v363_v48  ;;  %v366_v53 = vadd.f32 %v3314_v51, %v4174_v46  ;;  %v357_v54 = vpop.f32.mrb[3].mxu0  ;;  %vm419_vm0 = vcmp.gt.f32.partialorder %v363_v48, 0.0 }
 0x160   : > { %v433_v55 = vmul.f32 0.01, %v355_v50  ;;  %v358_v56 = vadd.f32 %v4174_v46, %v357_v54  ;;  %vm417_vm2 = vcmp.gt.f32.partialorder %v355_v50, 0.0 }
 0x161   : > { %vm420_vm1 = vcmp.gt.f32.partialorder %v366_v53, 0.0  ;;  %v436_v57 = vmul.f32 0.01, %v366_v53  ;;  %v451_v59 = vsel %vm419_vm0, %v363_v48, %v435_v52 }
 0x162   : > { %v434_v58 = vmul.f32 0.01, %v358_v56  ;;  %vm418_vm3 = vcmp.gt.f32.partialorder %v358_v56, 0.0  ;;  %v449_v62 = vsel %vm417_vm2, %v355_v50, %v433_v55 }
 0x163   : > { %v452_v60 = vsel %vm420_vm1, %v366_v53, %v436_v57  ;;  %v3768_v57 = vld [vmem:[#allocation4 + $0xb8] sm:$0xff]  }
 0x164   : > { %v3317_v61 = vpop.f32.mrb[4].mxu0  ;;  %v450_v63 = vsel %vm418_vm3, %v358_v56, %v434_v58  ;;  %v466_v0 = vpack.c.bf16 %v452_v60, %v451_v59  ;;  %v3767_v56 = vld [vmem:[#allocation4 + $0xb0] sm:$0xff]   ;;  %v3770_v58 = vld [vmem:[#allocation4 + $0xc8] sm:$0xff]   ;;  %v3772_v60 = vld [vmem:[#allocation4 + $0xd8] sm:$0xff]  }
 0x165   : > { %v379_v1 = vadd.f32 %v3317_v61, %v4174_v46  ;;  %v370_v2 = vpop.f32.mrb[5].mxu0  ;;  %v465_v3 = vpack.c.bf16 %v450_v63, %v449_v62  ;;  %3371 = vmatprep.subr.bf16.mxu0 %v3767_v56  ;;  %v3771_v59 = vld [vmem:[#allocation4 + $0xd0] sm:$0xff]   ;;  %v3773_v61 = vld [vmem:[#allocation4 + $0xe0] sm:$0xff]   ;;  %v3774_v62 = vld [vmem:[#allocation4 + $0xe8] sm:$0xff]  }
 0x166   : > { %v371_v4 = vadd.f32 %v4174_v46, %v370_v2  ;;  %v3318_v5 = vpop.f32.mrb[6].mxu0  ;;  %3372 = vmatpush3.bf16.msra.mxu0 %v3767_v56  ;;  %v4192_v63 = vld [vmem:[#allocation6 + $0x1] ss:$0 sm:$0xff] }
 0x167   : > { %v439_v6 = vmul.f32 0.01, %v379_v1  ;;  %v382_v7 = vadd.f32 %v3318_v5, %v4174_v46  ;;  %v373_v8 = vpop.f32.mrb[7].mxu0  ;;  %3343 = vmatprep.mubr.bf16.mxu1 %v465_v3  ;;  %vm423_vm4 = vcmp.gt.f32.partialorder %v379_v1, 0.0  ;;  %3373 = vmatprep.subr.bf16.mxu0 %v3768_v57 }
 0x168   : > { %v437_v9 = vmul.f32 0.01, %v371_v4  ;;  %v374_v10 = vadd.f32 %v4174_v46, %v373_v8  ;;  %3344 = vmatmul.mubr.bf16.vlgmr.msra.gmra.mrb[0].mxu1 %v466_v0  ;;  %vm421_vm5 = vcmp.gt.f32.partialorder %v371_v4, 0.0 }
 0x169   : > { %vm424_vm6 = vcmp.gt.f32.partialorder %v382_v7, 0.0  ;;  %v440_v11 = vmul.f32 0.01, %v382_v7  ;;  %v455_v13 = vsel %vm423_vm4, %v379_v1, %v439_v6 }
 0x16a   : > { %vm422_vm7 = vcmp.gt.f32.partialorder %v374_v10, 0.0  ;;  %v438_v12 = vmul.f32 0.01, %v374_v10  ;;  %v453_v16 = vsel %vm421_vm5, %v371_v4, %v437_v9  ;;  %3374 = vmatpush3.bf16.msra.mxu0 %v3768_v57 }
 0x16b   : > { %v456_v14 = vsel %vm424_vm6, %v382_v7, %v440_v11 }
 0x16c   : > { %v3321_v15 = vpop.f32.mrb[8].mxu0  ;;  %v454_v17 = vsel %vm422_vm7, %v374_v10, %v438_v12  ;;  %v468_v18 = vpack.c.bf16 %v456_v14, %v455_v13 }
 0x16d   : > { %v395_v19 = vadd.f32 %v3321_v15, %v4174_v46  ;;  %v386_v20 = vpop.f32.mrb[9].mxu0  ;;  %v467_v21 = vpack.c.bf16 %v454_v17, %v453_v16 }
 0x16e   : > { %v387_v22 = vadd.f32 %v4174_v46, %v386_v20  ;;  %v3322_v23 = vpop.f32.mrb[10].mxu0 }
 0x16f   : > { %v443_v24 = vmul.f32 0.01, %v395_v19  ;;  %v398_v25 = vadd.f32 %v3322_v23, %v4174_v46  ;;  %v389_v26 = vpop.f32.mrb[11].mxu0  ;;  %3347 = vmatprep.mubr.bf16.mxu1 %v467_v21  ;;  %vm427_vm8 = vcmp.gt.f32.partialorder %v395_v19, 0.0 }
 0x170   : > { %v441_v27 = vmul.f32 0.01, %v387_v22  ;;  %v390_v28 = vadd.f32 %v4174_v46, %v389_v26  ;;  %3348 = vmatmul.mubr.bf16.gmra.mrb[4].mxu1 %v468_v18  ;;  %vm425_vm9 = vcmp.gt.f32.partialorder %v387_v22, 0.0 }
 0x171   : > { %vm428_vm10 = vcmp.gt.f32.partialorder %v398_v25, 0.0  ;;  %v444_v29 = vmul.f32 0.01, %v398_v25  ;;  %v459_v31 = vsel %vm427_vm8, %v395_v19, %v443_v24 }
 0x172   : > { %vm426_vm11 = vcmp.gt.f32.partialorder %v390_v28, 0.0  ;;  %v442_v30 = vmul.f32 0.01, %v390_v28  ;;  %v457_v34 = vsel %vm425_vm9, %v387_v22, %v441_v27 }
 0x173   : > { %v460_v32 = vsel %vm428_vm10, %v398_v25, %v444_v29 }
 0x174   : > { %v3325_v33 = vpop.f32.mrb[12].mxu0  ;;  %v458_v35 = vsel %vm426_vm11, %v390_v28, %v442_v30  ;;  %v470_v36 = vpack.c.bf16 %v460_v32, %v459_v31 }
 0x175   : > { %v411_v37 = vadd.f32 %v3325_v33, %v4174_v46  ;;  %v402_v38 = vpop.f32.mrb[13].mxu0  ;;  %v469_v39 = vpack.c.bf16 %v458_v35, %v457_v34 }
 0x176   : > { %v403_v40 = vadd.f32 %v4174_v46, %v402_v38  ;;  %v3326_v41 = vpop.f32.mrb[14].mxu0 }
 0x177   : > { %v447_v42 = vmul.f32 0.01, %v411_v37  ;;  %v414_v43 = vadd.f32 %v3326_v41, %v4174_v46  ;;  %v405_v44 = vpop.f32.mrb[15].mxu0  ;;  %3351 = vmatprep.mubr.bf16.mxu1 %v469_v39  ;;  %vm431_vm12 = vcmp.gt.f32.partialorder %v411_v37, 0.0 }
 0x178   : > { %v445_v45 = vmul.f32 0.01, %v403_v40  ;;  %v406_v47 = vadd.f32 %v4174_v46, %v405_v44  ;;  %3352 = vmatmul.mubr.bf16.gmra.mrb[8].mxu1 %v470_v36  ;;  %vm429_vm13 = vcmp.gt.f32.partialorder %v403_v40, 0.0  ;;  %v3769_v46 = vld [vmem:[#allocation4 + $0xc0] sm:$0xff]  }
 0x179   : > { %vm432_vm14 = vcmp.gt.f32.partialorder %v414_v43, 0.0  ;;  %v448_v48 = vmul.f32 0.01, %v414_v43  ;;  %v463_v50 = vsel %vm431_vm12, %v411_v37, %v447_v42  ;;  %3391 = vmatprep.subr.bf16.mxu1 %v3769_v46 }
 0x17a   : > { %vm430_vm15 = vcmp.gt.f32.partialorder %v406_v47, 0.0  ;;  %v446_v49 = vmul.f32 0.01, %v406_v47  ;;  %v461_v52 = vsel %vm429_vm13, %v403_v40, %v445_v45  ;;  %3392 = vmatpush3.bf16.msra.mxu1 %v3769_v46 }
 0x17b   : > { %v464_v51 = vsel %vm432_vm14, %v414_v43, %v448_v48  ;;  %3393 = vmatprep.subr.bf16.mxu1 %v3770_v58 }
 0x17c   : > { %v462_v53 = vsel %vm430_vm15, %v406_v47, %v446_v49  ;;  %v472_v54 = vpack.c.bf16 %v464_v51, %v463_v50 }
 0x17d   : > { %v471_v55 = vpack.c.bf16 %v462_v53, %v461_v52 }
 0x17e   : > { %3394 = vmatpush3.bf16.msra.mxu1 %v3770_v58 }
 0x17f   : > { %3355 = vmatprep.mubr.bf16.mxu1 %v471_v55  ;;  %3395 = vmatprep.subr.bf16.mxu1 %v3771_v59 }
 0x180   : > { %3356 = vmatmul.mubr.bf16.gmra.mrb[12].mxu1 %v472_v54 }
 0x182   : > { %3396 = vmatpush3.bf16.msra.mxu1 %v3771_v59 }
 0x183   : > { %3397 = vmatprep.subr.bf16.mxu1 %v3772_v60 }
 0x186   : > { %3398 = vmatpush3.bf16.msra.mxu1 %v3772_v60 }
 0x187   : > { %3399 = vmatprep.subr.bf16.mxu1 %v3773_v61 }
 0x18a   : > { %3400 = vmatpush3.bf16.msra.mxu1 %v3773_v61 }
 0x18b   : > { %3401 = vmatprep.subr.bf16.mxu1 %v3774_v62 }
 0x18e   : > { %3402 = vmatpush3.bf16.msra.mxu1 %v3774_v62 }
 0x23b   : > { %v3345_v0 = vpop.f32.mrb[0].mxu1 }
 0x23c   : > { %v589_v1 = vadd.f32 %v3345_v0, %v4192_v63  ;;  %v580_v2 = vpop.f32.mrb[1].mxu1 }
 0x23d   : > { %v581_v3 = vadd.f32 %v4192_v63, %v580_v2  ;;  %v3346_v4 = vpop.f32.mrb[2].mxu1 }
 0x23e   : > { %v661_v5 = vmul.f32 0.01, %v589_v1  ;;  %v592_v6 = vadd.f32 %v3346_v4, %v4192_v63  ;;  %v583_v7 = vpop.f32.mrb[3].mxu1  ;;  %vm645_vm0 = vcmp.gt.f32.partialorder %v589_v1, 0.0 }
 0x23f   : > { %v659_v8 = vmul.f32 0.01, %v581_v3  ;;  %v584_v9 = vadd.f32 %v4192_v63, %v583_v7  ;;  %vm643_vm1 = vcmp.gt.f32.partialorder %v581_v3, 0.0 }
 0x240   : > { %vm646_vm2 = vcmp.gt.f32.partialorder %v592_v6, 0.0  ;;  %v662_v10 = vmul.f32 0.01, %v592_v6  ;;  %v677_v12 = vsel %vm645_vm0, %v589_v1, %v661_v5 }
 0x241   : > { %vm644_vm3 = vcmp.gt.f32.partialorder %v584_v9, 0.0  ;;  %v660_v11 = vmul.f32 0.01, %v584_v9  ;;  %v675_v16 = vsel %vm643_vm1, %v581_v3, %v659_v8 }
 0x242   : > { %v678_v13 = vsel %vm646_vm2, %v592_v6, %v662_v10  ;;  %v3776_v10 = vld [vmem:[#allocation4 + $0xf8] sm:$0xff]  }
 0x243   : > { %v692_v14 = vpack.c.bf16 %v678_v13, %v677_v12  ;;  %v3349_v15 = vpop.f32.mrb[4].mxu1  ;;  %v676_v17 = vsel %vm644_vm3, %v584_v9, %v660_v11  ;;  %v3775_v9 = vld [vmem:[#allocation4 + $0xf0] sm:$0xff]   ;;  %v3778_v11 = vld [vmem:[#allocation4 + $0x108] sm:$0xff]   ;;  %v3780_v13 = vld [vmem:[#allocation4 + $0x118] sm:$0xff]  }
 0x244   : > { %v605_v18 = vadd.f32 %v3349_v15, %v4192_v63  ;;  %v596_v19 = vpop.f32.mrb[5].mxu1  ;;  %v691_v20 = vpack.c.bf16 %v676_v17, %v675_v16  ;;  %3403 = vmatprep.subr.bf16.mxu1 %v3775_v9  ;;  %v3779_v12 = vld [vmem:[#allocation4 + $0x110] sm:$0xff]   ;;  %v3782_v15 = vld [vmem:[#allocation4 + $0x128] sm:$0xff]   ;;  %v4210_v16 = vld [vmem:[#allocation6 + $0x2] ss:$0 sm:$0xff] }
 0x245   : > { %v597_v21 = vadd.f32 %v4192_v63, %v596_v19  ;;  %v3350_v22 = vpop.f32.mrb[6].mxu1  ;;  %3404 = vmatpush3.bf16.msra.mxu1 %v3775_v9 }
 0x246   : > { %v665_v23 = vmul.f32 0.01, %v605_v18  ;;  %v608_v24 = vadd.f32 %v3350_v22, %v4192_v63  ;;  %v599_v25 = vpop.f32.mrb[7].mxu1  ;;  %3375 = vmatprep.mubr.bf16.mxu0 %v691_v20  ;;  %vm649_vm4 = vcmp.gt.f32.partialorder %v605_v18, 0.0  ;;  %3405 = vmatprep.subr.bf16.mxu1 %v3776_v10 }
 0x247   : > { %v663_v26 = vmul.f32 0.01, %v597_v21  ;;  %v600_v27 = vadd.f32 %v4192_v63, %v599_v25  ;;  %3376 = vmatmul.mubr.bf16.vlgmr.msra.gmra.mrb[16].mxu0 %v692_v14  ;;  %vm647_vm5 = vcmp.gt.f32.partialorder %v597_v21, 0.0  ;;  %v3781_v14 = vld [vmem:[#allocation4 + $0x120] sm:$0xff]  }
 0x248   : > { %vm650_vm6 = vcmp.gt.f32.partialorder %v608_v24, 0.0  ;;  %v666_v28 = vmul.f32 0.01, %v608_v24  ;;  %v681_v30 = vsel %vm649_vm4, %v605_v18, %v665_v23 }
 0x249   : > { %vm648_vm7 = vcmp.gt.f32.partialorder %v600_v27, 0.0  ;;  %v664_v29 = vmul.f32 0.01, %v600_v27  ;;  %v679_v33 = vsel %vm647_vm5, %v597_v21, %v663_v26  ;;  %3406 = vmatpush3.bf16.msra.mxu1 %v3776_v10 }
 0x24a   : > { %v682_v31 = vsel %vm650_vm6, %v608_v24, %v666_v28 }
 0x24b   : > { %v3353_v32 = vpop.f32.mrb[8].mxu1  ;;  %v680_v34 = vsel %vm648_vm7, %v600_v27, %v664_v29  ;;  %v694_v35 = vpack.c.bf16 %v682_v31, %v681_v30 }
 0x24c   : > { %v621_v36 = vadd.f32 %v3353_v32, %v4192_v63  ;;  %v612_v37 = vpop.f32.mrb[9].mxu1  ;;  %v693_v38 = vpack.c.bf16 %v680_v34, %v679_v33 }
 0x24d   : > { %v613_v39 = vadd.f32 %v4192_v63, %v612_v37  ;;  %v3354_v40 = vpop.f32.mrb[10].mxu1 }
 0x24e   : > { %v669_v41 = vmul.f32 0.01, %v621_v36  ;;  %v624_v42 = vadd.f32 %v3354_v40, %v4192_v63  ;;  %v615_v43 = vpop.f32.mrb[11].mxu1  ;;  %3379 = vmatprep.mubr.bf16.mxu0 %v693_v38  ;;  %vm653_vm8 = vcmp.gt.f32.partialorder %v621_v36, 0.0 }
 0x24f   : > { %v667_v44 = vmul.f32 0.01, %v613_v39  ;;  %v616_v45 = vadd.f32 %v4192_v63, %v615_v43  ;;  %3380 = vmatmul.mubr.bf16.gmra.mrb[20].mxu0 %v694_v35  ;;  %vm651_vm9 = vcmp.gt.f32.partialorder %v613_v39, 0.0 }
 0x250   : > { %vm654_vm10 = vcmp.gt.f32.partialorder %v624_v42, 0.0  ;;  %v670_v47 = vmul.f32 0.01, %v624_v42  ;;  %v685_v49 = vsel %vm653_vm8, %v621_v36, %v669_v41 }
 0x251   : > { %vm652_vm11 = vcmp.gt.f32.partialorder %v616_v45, 0.0  ;;  %v668_v48 = vmul.f32 0.01, %v616_v45  ;;  %v683_v52 = vsel %vm651_vm9, %v613_v39, %v667_v44 }
 0x252   : > { %v686_v50 = vsel %vm654_vm10, %v624_v42, %v670_v47 }
 0x253   : > { %v3357_v51 = vpop.f32.mrb[12].mxu1  ;;  %v684_v53 = vsel %vm652_vm11, %v616_v45, %v668_v48  ;;  %v696_v54 = vpack.c.bf16 %v686_v50, %v685_v49 }
 0x254   : > { %v637_v55 = vadd.f32 %v3357_v51, %v4192_v63  ;;  %v628_v56 = vpop.f32.mrb[13].mxu1  ;;  %v695_v57 = vpack.c.bf16 %v684_v53, %v683_v52 }
 0x255   : > { %v629_v46 = vadd.f32 %v4192_v63, %v628_v56  ;;  %v3358_v58 = vpop.f32.mrb[14].mxu1 }
 0x256   : > { %v673_v59 = vmul.f32 0.01, %v637_v55  ;;  %v640_v60 = vadd.f32 %v3358_v58, %v4192_v63  ;;  %v631_v61 = vpop.f32.mrb[15].mxu1  ;;  %3383 = vmatprep.mubr.bf16.mxu0 %v695_v57  ;;  %vm657_vm12 = vcmp.gt.f32.partialorder %v637_v55, 0.0 }
 0x257   : > { %v671_v62 = vmul.f32 0.01, %v629_v46  ;;  %v632_v0 = vadd.f32 %v4192_v63, %v631_v61  ;;  %3384 = vmatmul.mubr.bf16.gmra.mrb[24].mxu0 %v696_v54  ;;  %vm655_vm13 = vcmp.gt.f32.partialorder %v629_v46, 0.0  ;;  %v3777_v63 = vld [vmem:[#allocation4 + $0x100] sm:$0xff]  }
 0x258   : > { %vm658_vm14 = vcmp.gt.f32.partialorder %v640_v60, 0.0  ;;  %v674_v1 = vmul.f32 0.01, %v640_v60  ;;  %v689_v3 = vsel %vm657_vm12, %v637_v55, %v673_v59  ;;  %3423 = vmatprep.subr.bf16.mxu0 %v3777_v63 }
 0x259   : > { %vm656_vm15 = vcmp.gt.f32.partialorder %v632_v0, 0.0  ;;  %v672_v2 = vmul.f32 0.01, %v632_v0  ;;  %v687_v5 = vsel %vm655_vm13, %v629_v46, %v671_v62  ;;  %3424 = vmatpush3.bf16.msra.mxu0 %v3777_v63 }
 0x25a   : > { %v690_v4 = vsel %vm658_vm14, %v640_v60, %v674_v1  ;;  %3425 = vmatprep.subr.bf16.mxu0 %v3778_v11 }
 0x25b   : > { %v688_v6 = vsel %vm656_vm15, %v632_v0, %v672_v2  ;;  %v698_v7 = vpack.c.bf16 %v690_v4, %v689_v3 }
 0x25c   : > { %v697_v8 = vpack.c.bf16 %v688_v6, %v687_v5 }
 0x25d   : > { %3426 = vmatpush3.bf16.msra.mxu0 %v3778_v11 }
 0x25e   : > { %3387 = vmatprep.mubr.bf16.mxu0 %v697_v8  ;;  %3427 = vmatprep.subr.bf16.mxu0 %v3779_v12 }
 0x25f   : > { %3388 = vmatmul.mubr.bf16.gmra.mrb[28].mxu0 %v698_v7 }
 0x261   : > { %3428 = vmatpush3.bf16.msra.mxu0 %v3779_v12 }
 0x262   : > { %3429 = vmatprep.subr.bf16.mxu0 %v3780_v13 }
 0x265   : > { %3430 = vmatpush3.bf16.msra.mxu0 %v3780_v13 }
 0x266   : > { %3431 = vmatprep.subr.bf16.mxu0 %v3781_v14 }
 0x269   : > { %3432 = vmatpush3.bf16.msra.mxu0 %v3781_v14 }
 0x26a   : > { %3433 = vmatprep.subr.bf16.mxu0 %v3782_v15 }
 0x26d   : > { %3434 = vmatpush3.bf16.msra.mxu0 %v3782_v15 }
 0x31a   : > { %v3377_v17 = vpop.f32.mrb[16].mxu0 }
 0x31b   : > { %v815_v18 = vadd.f32 %v3377_v17, %v4210_v16  ;;  %v806_v19 = vpop.f32.mrb[17].mxu0 }
 0x31c   : > { %v807_v20 = vadd.f32 %v4210_v16, %v806_v19  ;;  %v3378_v21 = vpop.f32.mrb[18].mxu0 }
 0x31d   : > { %v887_v22 = vmul.f32 0.01, %v815_v18  ;;  %v818_v23 = vadd.f32 %v3378_v21, %v4210_v16  ;;  %v809_v24 = vpop.f32.mrb[19].mxu0  ;;  %vm871_vm0 = vcmp.gt.f32.partialorder %v815_v18, 0.0 }
 0x31e   : > { %v885_v25 = vmul.f32 0.01, %v807_v20  ;;  %v810_v26 = vadd.f32 %v4210_v16, %v809_v24  ;;  %vm869_vm1 = vcmp.gt.f32.partialorder %v807_v20, 0.0 }
 0x31f   : > { %vm872_vm2 = vcmp.gt.f32.partialorder %v818_v23, 0.0  ;;  %v888_v27 = vmul.f32 0.01, %v818_v23  ;;  %v903_v29 = vsel %vm871_vm0, %v815_v18, %v887_v22 }
 0x320   : > { %vm870_vm3 = vcmp.gt.f32.partialorder %v810_v26, 0.0  ;;  %v886_v28 = vmul.f32 0.01, %v810_v26  ;;  %v901_v33 = vsel %vm869_vm1, %v807_v20, %v885_v25 }
 0x321   : > { %v904_v30 = vsel %vm872_vm2, %v818_v23, %v888_v27  ;;  %v3784_v27 = vld [vmem:[#allocation4 + $0x138] sm:$0xff]  }
 0x322   : > { %v918_v31 = vpack.c.bf16 %v904_v30, %v903_v29  ;;  %v3381_v32 = vpop.f32.mrb[20].mxu0  ;;  %v902_v34 = vsel %vm870_vm3, %v810_v26, %v886_v28  ;;  %v3783_v26 = vld [vmem:[#allocation4 + $0x130] sm:$0xff]   ;;  %v3786_v28 = vld [vmem:[#allocation4 + $0x148] sm:$0xff]   ;;  %v3788_v30 = vld [vmem:[#allocation4 + $0x158] sm:$0xff]  }
 0x323   : > { %v831_v35 = vadd.f32 %v3381_v32, %v4210_v16  ;;  %v822_v36 = vpop.f32.mrb[21].mxu0  ;;  %v917_v37 = vpack.c.bf16 %v902_v34, %v901_v33  ;;  %3435 = vmatprep.subr.bf16.mxu0 %v3783_v26  ;;  %v3787_v29 = vld [vmem:[#allocation4 + $0x150] sm:$0xff]   ;;  %v3790_v32 = vld [vmem:[#allocation4 + $0x168] sm:$0xff]   ;;  %v4228_v33 = vld [vmem:[#allocation6 + $0x3] ss:$0 sm:$0xff] }
 0x324   : > { %v823_v38 = vadd.f32 %v4210_v16, %v822_v36  ;;  %v3382_v39 = vpop.f32.mrb[22].mxu0  ;;  %3436 = vmatpush3.bf16.msra.mxu0 %v3783_v26 }
 0x325   : > { %v891_v40 = vmul.f32 0.01, %v831_v35  ;;  %v834_v41 = vadd.f32 %v3382_v39, %v4210_v16  ;;  %v825_v42 = vpop.f32.mrb[23].mxu0  ;;  %3407 = vmatprep.mubr.bf16.mxu1 %v917_v37  ;;  %vm875_vm4 = vcmp.gt.f32.partialorder %v831_v35, 0.0  ;;  %3437 = vmatprep.subr.bf16.mxu0 %v3784_v27 }
 0x326   : > { %v889_v43 = vmul.f32 0.01, %v823_v38  ;;  %v826_v44 = vadd.f32 %v4210_v16, %v825_v42  ;;  %3408 = vmatmul.mubr.bf16.vlgmr.msra.gmra.mrb[16].mxu1 %v918_v31  ;;  %vm873_vm5 = vcmp.gt.f32.partialorder %v823_v38, 0.0  ;;  %v3789_v31 = vld [vmem:[#allocation4 + $0x160] sm:$0xff]  }
 0x327   : > { %vm876_vm6 = vcmp.gt.f32.partialorder %v834_v41, 0.0  ;;  %v892_v45 = vmul.f32 0.01, %v834_v41  ;;  %v907_v48 = vsel %vm875_vm4, %v831_v35, %v891_v40 }
 0x328   : > { %vm874_vm7 = vcmp.gt.f32.partialorder %v826_v44, 0.0  ;;  %v890_v47 = vmul.f32 0.01, %v826_v44  ;;  %v905_v51 = vsel %vm873_vm5, %v823_v38, %v889_v43  ;;  %3438 = vmatpush3.bf16.msra.mxu0 %v3784_v27 }
 0x329   : > { %v908_v49 = vsel %vm876_vm6, %v834_v41, %v892_v45 }
 0x32a   : > { %v3385_v50 = vpop.f32.mrb[24].mxu0  ;;  %v906_v52 = vsel %vm874_vm7, %v826_v44, %v890_v47  ;;  %v920_v53 = vpack.c.bf16 %v908_v49, %v907_v48 }
 0x32b   : > { %v847_v54 = vadd.f32 %v3385_v50, %v4210_v16  ;;  %v838_v55 = vpop.f32.mrb[25].mxu0  ;;  %v919_v56 = vpack.c.bf16 %v906_v52, %v905_v51 }
 0x32c   : > { %v839_v57 = vadd.f32 %v4210_v16, %v838_v55  ;;  %v3386_v46 = vpop.f32.mrb[26].mxu0 }
 0x32d   : > { %v895_v58 = vmul.f32 0.01, %v847_v54  ;;  %v850_v59 = vadd.f32 %v3386_v46, %v4210_v16  ;;  %v841_v60 = vpop.f32.mrb[27].mxu0  ;;  %3411 = vmatprep.mubr.bf16.mxu1 %v919_v56  ;;  %vm879_vm8 = vcmp.gt.f32.partialorder %v847_v54, 0.0 }
 0x32e   : > { %v893_v61 = vmul.f32 0.01, %v839_v57  ;;  %v842_v62 = vadd.f32 %v4210_v16, %v841_v60  ;;  %3412 = vmatmul.mubr.bf16.gmra.mrb[20].mxu1 %v920_v53  ;;  %vm877_vm9 = vcmp.gt.f32.partialorder %v839_v57, 0.0 }
 0x32f   : > { %vm880_vm10 = vcmp.gt.f32.partialorder %v850_v59, 0.0  ;;  %v896_v0 = vmul.f32 0.01, %v850_v59  ;;  %v911_v2 = vsel %vm879_vm8, %v847_v54, %v895_v58 }
 0x330   : > { %vm878_vm11 = vcmp.gt.f32.partialorder %v842_v62, 0.0  ;;  %v894_v1 = vmul.f32 0.01, %v842_v62  ;;  %v909_v5 = vsel %vm877_vm9, %v839_v57, %v893_v61 }
 0x331   : > { %v912_v3 = vsel %vm880_vm10, %v850_v59, %v896_v0 }
 0x332   : > { %v3389_v4 = vpop.f32.mrb[28].mxu0  ;;  %v910_v6 = vsel %vm878_vm11, %v842_v62, %v894_v1  ;;  %v922_v7 = vpack.c.bf16 %v912_v3, %v911_v2 }
 0x333   : > { %v863_v8 = vadd.f32 %v3389_v4, %v4210_v16  ;;  %v854_v9 = vpop.f32.mrb[29].mxu0  ;;  %v921_v10 = vpack.c.bf16 %v910_v6, %v909_v5 }
 0x334   : > { %v855_v63 = vadd.f32 %v4210_v16, %v854_v9  ;;  %v3390_v11 = vpop.f32.mrb[30].mxu0 }
 0x335   : > { %v899_v12 = vmul.f32 0.01, %v863_v8  ;;  %v866_v13 = vadd.f32 %v3390_v11, %v4210_v16  ;;  %v857_v14 = vpop.f32.mrb[31].mxu0  ;;  %3415 = vmatprep.mubr.bf16.mxu1 %v921_v10  ;;  %vm883_vm12 = vcmp.gt.f32.partialorder %v863_v8, 0.0 }
 0x336   : > { %v897_v15 = vmul.f32 0.01, %v855_v63  ;;  %v858_v17 = vadd.f32 %v4210_v16, %v857_v14  ;;  %3416 = vmatmul.mubr.bf16.gmra.mrb[24].mxu1 %v922_v7  ;;  %vm881_vm13 = vcmp.gt.f32.partialorder %v855_v63, 0.0  ;;  %v3785_v16 = vld [vmem:[#allocation4 + $0x140] sm:$0xff]  }
 0x337   : > { %vm884_vm14 = vcmp.gt.f32.partialorder %v866_v13, 0.0  ;;  %v900_v18 = vmul.f32 0.01, %v866_v13  ;;  %v915_v20 = vsel %vm883_vm12, %v863_v8, %v899_v12  ;;  %3455 = vmatprep.subr.bf16.mxu1 %v3785_v16 }
 0x338   : > { %vm882_vm15 = vcmp.gt.f32.partialorder %v858_v17, 0.0  ;;  %v898_v19 = vmul.f32 0.01, %v858_v17  ;;  %v913_v22 = vsel %vm881_vm13, %v855_v63, %v897_v15  ;;  %3456 = vmatpush3.bf16.msra.mxu1 %v3785_v16 }
 0x339   : > { %v916_v21 = vsel %vm884_vm14, %v866_v13, %v900_v18  ;;  %3457 = vmatprep.subr.bf16.mxu1 %v3786_v28 }
 0x33a   : > { %v914_v23 = vsel %vm882_vm15, %v858_v17, %v898_v19  ;;  %v924_v24 = vpack.c.bf16 %v916_v21, %v915_v20 }
 0x33b   : > { %v923_v25 = vpack.c.bf16 %v914_v23, %v913_v22 }
 0x33c   : > { %3458 = vmatpush3.bf16.msra.mxu1 %v3786_v28 }
 0x33d   : > { %3419 = vmatprep.mubr.bf16.mxu1 %v923_v25  ;;  %3459 = vmatprep.subr.bf16.mxu1 %v3787_v29 }
 0x33e   : > { %3420 = vmatmul.mubr.bf16.gmra.mrb[28].mxu1 %v924_v24 }
 0x340   : > { %3460 = vmatpush3.bf16.msra.mxu1 %v3787_v29 }
 0x341   : > { %3461 = vmatprep.subr.bf16.mxu1 %v3788_v30 }
 0x344   : > { %3462 = vmatpush3.bf16.msra.mxu1 %v3788_v30 }
 0x345   : > { %3463 = vmatprep.subr.bf16.mxu1 %v3789_v31 }
 0x348   : > { %3464 = vmatpush3.bf16.msra.mxu1 %v3789_v31 }
 0x349   : > { %3465 = vmatprep.subr.bf16.mxu1 %v3790_v32 }
 0x34c   : > { %3466 = vmatpush3.bf16.msra.mxu1 %v3790_v32 }
 0x3f9   : > { %v3409_v34 = vpop.f32.mrb[16].mxu1 }
 0x3fa   : > { %v1041_v35 = vadd.f32 %v3409_v34, %v4228_v33  ;;  %v1032_v36 = vpop.f32.mrb[17].mxu1 }
 0x3fb   : > { %v1033_v37 = vadd.f32 %v4228_v33, %v1032_v36  ;;  %v3410_v38 = vpop.f32.mrb[18].mxu1 }
 0x3fc   : > { %v1113_v39 = vmul.f32 0.01, %v1041_v35  ;;  %v1044_v40 = vadd.f32 %v3410_v38, %v4228_v33  ;;  %v1035_v41 = vpop.f32.mrb[19].mxu1  ;;  %vm1097_vm0 = vcmp.gt.f32.partialorder %v1041_v35, 0.0 }
 0x3fd   : > { %v1111_v42 = vmul.f32 0.01, %v1033_v37  ;;  %v1036_v43 = vadd.f32 %v4228_v33, %v1035_v41  ;;  %vm1095_vm1 = vcmp.gt.f32.partialorder %v1033_v37, 0.0 }
 0x3fe   : > { %vm1098_vm2 = vcmp.gt.f32.partialorder %v1044_v40, 0.0  ;;  %v1114_v44 = vmul.f32 0.01, %v1044_v40  ;;  %v1129_v47 = vsel %vm1097_vm0, %v1041_v35, %v1113_v39 }
 0x3ff   : > { %vm1096_vm3 = vcmp.gt.f32.partialorder %v1036_v43, 0.0  ;;  %v1112_v45 = vmul.f32 0.01, %v1036_v43  ;;  %v1127_v51 = vsel %vm1095_vm1, %v1033_v37, %v1111_v42 }
 0x400   : > { %v1130_v48 = vsel %vm1098_vm2, %v1044_v40, %v1114_v44  ;;  %v3792_v44 = vld [vmem:[#allocation4 + $0x178] sm:$0xff]  }
 0x401   : > { %v1144_v49 = vpack.c.bf16 %v1130_v48, %v1129_v47  ;;  %v3413_v50 = vpop.f32.mrb[20].mxu1  ;;  %v1128_v52 = vsel %vm1096_vm3, %v1036_v43, %v1112_v45  ;;  %v3791_v43 = vld [vmem:[#allocation4 + $0x170] sm:$0xff]   ;;  %v3794_v45 = vld [vmem:[#allocation4 + $0x188] sm:$0xff]   ;;  %v3796_v48 = vld [vmem:[#allocation4 + $0x198] sm:$0xff]  }
 0x402   : > { %v1057_v53 = vadd.f32 %v3413_v50, %v4228_v33  ;;  %v1048_v54 = vpop.f32.mrb[21].mxu1  ;;  %v1143_v55 = vpack.c.bf16 %v1128_v52, %v1127_v51  ;;  %3467 = vmatprep.subr.bf16.mxu1 %v3791_v43  ;;  %v3795_v47 = vld [vmem:[#allocation4 + $0x190] sm:$0xff]   ;;  %v3798_v50 = vld [vmem:[#allocation4 + $0x1a8] sm:$0xff]   ;;  %v4246_v51 = vld [vmem:[#allocation6 + $0x4] ss:$0 sm:$0xff] }
 0x403   : > { %v1049_v56 = vadd.f32 %v4228_v33, %v1048_v54  ;;  %v3414_v57 = vpop.f32.mrb[22].mxu1  ;;  %3468 = vmatpush3.bf16.msra.mxu1 %v3791_v43 }
 0x404   : > { %v1117_v46 = vmul.f32 0.01, %v1057_v53  ;;  %v1060_v58 = vadd.f32 %v3414_v57, %v4228_v33  ;;  %v1051_v59 = vpop.f32.mrb[23].mxu1  ;;  %3439 = vmatprep.mubr.bf16.mxu0 %v1143_v55  ;;  %vm1101_vm4 = vcmp.gt.f32.partialorder %v1057_v53, 0.0  ;;  %3469 = vmatprep.subr.bf16.mxu1 %v3792_v44 }
 0x405   : > { %v1115_v60 = vmul.f32 0.01, %v1049_v56  ;;  %v1052_v61 = vadd.f32 %v4228_v33, %v1051_v59  ;;  %3440 = vmatmul.mubr.bf16.vlgmr.msra.gmra.mrb[32].mxu0 %v1144_v49  ;;  %vm1099_vm5 = vcmp.gt.f32.partialorder %v1049_v56, 0.0  ;;  %v3797_v49 = vld [vmem:[#allocation4 + $0x1a0] sm:$0xff]  }
 0x406   : > { %vm1102_vm6 = vcmp.gt.f32.partialorder %v1060_v58, 0.0  ;;  %v1118_v62 = vmul.f32 0.01, %v1060_v58  ;;  %v1133_v1 = vsel %vm1101_vm4, %v1057_v53, %v1117_v46 }
 0x407   : > { %vm1100_vm7 = vcmp.gt.f32.partialorder %v1052_v61, 0.0  ;;  %v1116_v0 = vmul.f32 0.01, %v1052_v61  ;;  %v1131_v4 = vsel %vm1099_vm5, %v1049_v56, %v1115_v60  ;;  %3470 = vmatpush3.bf16.msra.mxu1 %v3792_v44 }
 0x408   : > { %v1134_v2 = vsel %vm1102_vm6, %v1060_v58, %v1118_v62 }
 0x409   : > { %v3417_v3 = vpop.f32.mrb[24].mxu1  ;;  %v1132_v5 = vsel %vm1100_vm7, %v1052_v61, %v1116_v0  ;;  %v1146_v6 = vpack.c.bf16 %v1134_v2, %v1133_v1 }
 0x40a   : > { %v1073_v7 = vadd.f32 %v3417_v3, %v4228_v33  ;;  %v1064_v8 = vpop.f32.mrb[25].mxu1  ;;  %v1145_v9 = vpack.c.bf16 %v1132_v5, %v1131_v4 }
 0x40b   : > { %v1065_v10 = vadd.f32 %v4228_v33, %v1064_v8  ;;  %v3418_v63 = vpop.f32.mrb[26].mxu1 }
 0x40c   : > { %v1121_v11 = vmul.f32 0.01, %v1073_v7  ;;  %v1076_v12 = vadd.f32 %v3418_v63, %v4228_v33  ;;  %v1067_v13 = vpop.f32.mrb[27].mxu1  ;;  %3443 = vmatprep.mubr.bf16.mxu0 %v1145_v9  ;;  %vm1105_vm8 = vcmp.gt.f32.partialorder %v1073_v7, 0.0 }
 0x40d   : > { %v1119_v14 = vmul.f32 0.01, %v1065_v10  ;;  %v1068_v15 = vadd.f32 %v4228_v33, %v1067_v13  ;;  %3444 = vmatmul.mubr.bf16.gmra.mrb[36].mxu0 %v1146_v6  ;;  %vm1103_vm9 = vcmp.gt.f32.partialorder %v1065_v10, 0.0 }
 0x40e   : > { %vm1106_vm10 = vcmp.gt.f32.partialorder %v1076_v12, 0.0  ;;  %v1122_v17 = vmul.f32 0.01, %v1076_v12  ;;  %v1137_v19 = vsel %vm1105_vm8, %v1073_v7, %v1121_v11 }
 0x40f   : > { %vm1104_vm11 = vcmp.gt.f32.partialorder %v1068_v15, 0.0  ;;  %v1120_v18 = vmul.f32 0.01, %v1068_v15  ;;  %v1135_v22 = vsel %vm1103_vm9, %v1065_v10, %v1119_v14 }
 0x410   : > { %v1138_v20 = vsel %vm1106_vm10, %v1076_v12, %v1122_v17 }
 0x411   : > { %v3421_v21 = vpop.f32.mrb[28].mxu1  ;;  %v1136_v23 = vsel %vm1104_vm11, %v1068_v15, %v1120_v18  ;;  %v1148_v24 = vpack.c.bf16 %v1138_v20, %v1137_v19 }
 0x412   : > { %v1089_v25 = vadd.f32 %v3421_v21, %v4228_v33  ;;  %v1080_v26 = vpop.f32.mrb[29].mxu1  ;;  %v1147_v27 = vpack.c.bf16 %v1136_v23, %v1135_v22 }
 0x413   : > { %v1081_v16 = vadd.f32 %v4228_v33, %v1080_v26  ;;  %v3422_v28 = vpop.f32.mrb[30].mxu1 }
 0x414   : > { %v1125_v29 = vmul.f32 0.01, %v1089_v25  ;;  %v1092_v30 = vadd.f32 %v3422_v28, %v4228_v33  ;;  %v1083_v31 = vpop.f32.mrb[31].mxu1  ;;  %3447 = vmatprep.mubr.bf16.mxu0 %v1147_v27  ;;  %vm1109_vm12 = vcmp.gt.f32.partialorder %v1089_v25, 0.0 }
 0x415   : > { %v1123_v32 = vmul.f32 0.01, %v1081_v16  ;;  %v1084_v34 = vadd.f32 %v4228_v33, %v1083_v31  ;;  %3448 = vmatmul.mubr.bf16.gmra.mrb[40].mxu0 %v1148_v24  ;;  %vm1107_vm13 = vcmp.gt.f32.partialorder %v1081_v16, 0.0  ;;  %v3793_v33 = vld [vmem:[#allocation4 + $0x180] sm:$0xff]  }
 0x416   : > { %vm1110_vm14 = vcmp.gt.f32.partialorder %v1092_v30, 0.0  ;;  %v1126_v35 = vmul.f32 0.01, %v1092_v30  ;;  %v1141_v37 = vsel %vm1109_vm12, %v1089_v25, %v1125_v29  ;;  %3487 = vmatprep.subr.bf16.mxu0 %v3793_v33 }
 0x417   : > { %vm1108_vm15 = vcmp.gt.f32.partialorder %v1084_v34, 0.0  ;;  %v1124_v36 = vmul.f32 0.01, %v1084_v34  ;;  %v1139_v39 = vsel %vm1107_vm13, %v1081_v16, %v1123_v32  ;;  %3488 = vmatpush3.bf16.msra.mxu0 %v3793_v33 }
 0x418   : > { %v1142_v38 = vsel %vm1110_vm14, %v1092_v30, %v1126_v35  ;;  %3489 = vmatprep.subr.bf16.mxu0 %v3794_v45 }
 0x419   : > { %v1140_v40 = vsel %vm1108_vm15, %v1084_v34, %v1124_v36  ;;  %v1150_v41 = vpack.c.bf16 %v1142_v38, %v1141_v37 }
 0x41a   : > { %v1149_v42 = vpack.c.bf16 %v1140_v40, %v1139_v39 }
 0x41b   : > { %3490 = vmatpush3.bf16.msra.mxu0 %v3794_v45 }
 0x41c   : > { %3451 = vmatprep.mubr.bf16.mxu0 %v1149_v42  ;;  %3491 = vmatprep.subr.bf16.mxu0 %v3795_v47 }
 0x41d   : > { %3452 = vmatmul.mubr.bf16.gmra.mrb[44].mxu0 %v1150_v41 }
 0x41f   : > { %3492 = vmatpush3.bf16.msra.mxu0 %v3795_v47 }
 0x420   : > { %3493 = vmatprep.subr.bf16.mxu0 %v3796_v48 }
 0x423   : > { %3494 = vmatpush3.bf16.msra.mxu0 %v3796_v48 }
 0x424   : > { %3495 = vmatprep.subr.bf16.mxu0 %v3797_v49 }
 0x427   : > { %3496 = vmatpush3.bf16.msra.mxu0 %v3797_v49 }
 0x428   : > { %3497 = vmatprep.subr.bf16.mxu0 %v3798_v50 }
 0x42b   : > { %3498 = vmatpush3.bf16.msra.mxu0 %v3798_v50 }
 0x4d8   : > { %v3441_v52 = vpop.f32.mrb[32].mxu0 }
 0x4d9   : > { %v1267_v53 = vadd.f32 %v3441_v52, %v4246_v51  ;;  %v1258_v54 = vpop.f32.mrb[33].mxu0 }
 0x4da   : > { %v1259_v55 = vadd.f32 %v4246_v51, %v1258_v54  ;;  %v3442_v56 = vpop.f32.mrb[34].mxu0 }
 0x4db   : > { %v1339_v57 = vmul.f32 0.01, %v1267_v53  ;;  %v1270_v46 = vadd.f32 %v3442_v56, %v4246_v51  ;;  %v1261_v58 = vpop.f32.mrb[35].mxu0  ;;  %vm1323_vm0 = vcmp.gt.f32.partialorder %v1267_v53, 0.0 }
 0x4dc   : > { %v1337_v59 = vmul.f32 0.01, %v1259_v55  ;;  %v1262_v60 = vadd.f32 %v4246_v51, %v1261_v58  ;;  %vm1321_vm1 = vcmp.gt.f32.partialorder %v1259_v55, 0.0 }
 0x4dd   : > { %vm1324_vm2 = vcmp.gt.f32.partialorder %v1270_v46, 0.0  ;;  %v1340_v61 = vmul.f32 0.01, %v1270_v46  ;;  %v1355_v0 = vsel %vm1323_vm0, %v1267_v53, %v1339_v57 }
 0x4de   : > { %vm1322_vm3 = vcmp.gt.f32.partialorder %v1262_v60, 0.0  ;;  %v1338_v62 = vmul.f32 0.01, %v1262_v60  ;;  %v1353_v4 = vsel %vm1321_vm1, %v1259_v55, %v1337_v59 }
 0x4df   : > { %v1356_v1 = vsel %vm1324_vm2, %v1270_v46, %v1340_v61  ;;  %v3800_v61 = vld [vmem:[#allocation4 + $0x1b8] sm:$0xff]  }
 0x4e0   : > { %v1370_v2 = vpack.c.bf16 %v1356_v1, %v1355_v0  ;;  %v3445_v3 = vpop.f32.mrb[36].mxu0  ;;  %v1354_v5 = vsel %vm1322_vm3, %v1262_v60, %v1338_v62  ;;  %v3799_v60 = vld [vmem:[#allocation4 + $0x1b0] sm:$0xff]   ;;  %v3802_v62 = vld [vmem:[#allocation4 + $0x1c8] sm:$0xff]   ;;  %v3804_v1 = vld [vmem:[#allocation4 + $0x1d8] sm:$0xff]  }
 0x4e1   : > { %v1283_v6 = vadd.f32 %v3445_v3, %v4246_v51  ;;  %v1274_v7 = vpop.f32.mrb[37].mxu0  ;;  %v1369_v8 = vpack.c.bf16 %v1354_v5, %v1353_v4  ;;  %3499 = vmatprep.subr.bf16.mxu0 %v3799_v60  ;;  %v3803_v0 = vld [vmem:[#allocation4 + $0x1d0] sm:$0xff]   ;;  %v3806_v3 = vld [vmem:[#allocation4 + $0x1e8] sm:$0xff]   ;;  %v3036_v4 = vld [vmem:[#allocation6 + $0x5] ss:$0 sm:$0xff] }
 0x4e2   : > { %v1275_v9 = vadd.f32 %v4246_v51, %v1274_v7  ;;  %v3446_v10 = vpop.f32.mrb[38].mxu0  ;;  %3500 = vmatpush3.bf16.msra.mxu0 %v3799_v60 }
 0x4e3   : > { %v1343_v63 = vmul.f32 0.01, %v1283_v6  ;;  %v1286_v11 = vadd.f32 %v3446_v10, %v4246_v51  ;;  %v1277_v12 = vpop.f32.mrb[39].mxu0  ;;  %3471 = vmatprep.mubr.bf16.mxu1 %v1369_v8  ;;  %vm1327_vm4 = vcmp.gt.f32.partialorder %v1283_v6, 0.0  ;;  %3501 = vmatprep.subr.bf16.mxu0 %v3800_v61 }
 0x4e4   : > { %v1341_v13 = vmul.f32 0.01, %v1275_v9  ;;  %v1278_v14 = vadd.f32 %v4246_v51, %v1277_v12  ;;  %3472 = vmatmul.mubr.bf16.vlgmr.msra.gmra.mrb[32].mxu1 %v1370_v2  ;;  %vm1325_vm5 = vcmp.gt.f32.partialorder %v1275_v9, 0.0  ;;  %v3805_v2 = vld [vmem:[#allocation4 + $0x1e0] sm:$0xff]  }
 0x4e5   : > { %vm1328_vm6 = vcmp.gt.f32.partialorder %v1286_v11, 0.0  ;;  %v1344_v15 = vmul.f32 0.01, %v1286_v11  ;;  %v1359_v18 = vsel %vm1327_vm4, %v1283_v6, %v1343_v63 }
 0x4e6   : > { %vm1326_vm7 = vcmp.gt.f32.partialorder %v1278_v14, 0.0  ;;  %v1342_v17 = vmul.f32 0.01, %v1278_v14  ;;  %v1357_v21 = vsel %vm1325_vm5, %v1275_v9, %v1341_v13  ;;  %3502 = vmatpush3.bf16.msra.mxu0 %v3800_v61 }
 0x4e7   : > { %v1360_v19 = vsel %vm1328_vm6, %v1286_v11, %v1344_v15 }
 0x4e8   : > { %v3449_v20 = vpop.f32.mrb[40].mxu0  ;;  %v1358_v22 = vsel %vm1326_vm7, %v1278_v14, %v1342_v17  ;;  %v1372_v23 = vpack.c.bf16 %v1360_v19, %v1359_v18 }
 0x4e9   : > { %v1299_v24 = vadd.f32 %v3449_v20, %v4246_v51  ;;  %v1290_v25 = vpop.f32.mrb[41].mxu0  ;;  %v1371_v26 = vpack.c.bf16 %v1358_v22, %v1357_v21 }
 0x4ea   : > { %v1291_v27 = vadd.f32 %v4246_v51, %v1290_v25  ;;  %v3450_v16 = vpop.f32.mrb[42].mxu0 }
 0x4eb   : > { %v1347_v28 = vmul.f32 0.01, %v1299_v24  ;;  %v1302_v29 = vadd.f32 %v3450_v16, %v4246_v51  ;;  %v1293_v30 = vpop.f32.mrb[43].mxu0  ;;  %3475 = vmatprep.mubr.bf16.mxu1 %v1371_v26  ;;  %vm1331_vm8 = vcmp.gt.f32.partialorder %v1299_v24, 0.0 }
 0x4ec   : > { %v1345_v31 = vmul.f32 0.01, %v1291_v27  ;;  %v1294_v32 = vadd.f32 %v4246_v51, %v1293_v30  ;;  %3476 = vmatmul.mubr.bf16.gmra.mrb[36].mxu1 %v1372_v23  ;;  %vm1329_vm9 = vcmp.gt.f32.partialorder %v1291_v27, 0.0 }
 0x4ed   : > { %vm1332_vm10 = vcmp.gt.f32.partialorder %v1302_v29, 0.0  ;;  %v1348_v34 = vmul.f32 0.01, %v1302_v29  ;;  %v1363_v36 = vsel %vm1331_vm8, %v1299_v24, %v1347_v28 }
 0x4ee   : > { %vm1330_vm11 = vcmp.gt.f32.partialorder %v1294_v32, 0.0  ;;  %v1346_v35 = vmul.f32 0.01, %v1294_v32  ;;  %v1361_v39 = vsel %vm1329_vm9, %v1291_v27, %v1345_v31 }
 0x4ef   : > { %v1364_v37 = vsel %vm1332_vm10, %v1302_v29, %v1348_v34 }
 0x4f0   : > { %v3453_v38 = vpop.f32.mrb[44].mxu0  ;;  %v1362_v40 = vsel %vm1330_vm11, %v1294_v32, %v1346_v35  ;;  %v1374_v41 = vpack.c.bf16 %v1364_v37, %v1363_v36 }
 0x4f1   : > { %v1315_v42 = vadd.f32 %v3453_v38, %v4246_v51  ;;  %v1306_v43 = vpop.f32.mrb[45].mxu0  ;;  %v1373_v44 = vpack.c.bf16 %v1362_v40, %v1361_v39 }
 0x4f2   : > { %v1307_v33 = vadd.f32 %v4246_v51, %v1306_v43  ;;  %v3454_v45 = vpop.f32.mrb[46].mxu0 }
 0x4f3   : > { %v1351_v47 = vmul.f32 0.01, %v1315_v42  ;;  %v1318_v48 = vadd.f32 %v3454_v45, %v4246_v51  ;;  %v1309_v49 = vpop.f32.mrb[47].mxu0  ;;  %3479 = vmatprep.mubr.bf16.mxu1 %v1373_v44  ;;  %vm1335_vm12 = vcmp.gt.f32.partialorder %v1315_v42, 0.0  ;;  %v3808_v45 = vld [vmem:[#allocation4 + $0x1f8] sm:$0xff]  }
 0x4f4   : > { %v1349_v50 = vmul.f32 0.01, %v1307_v33  ;;  %v1310_v52 = vadd.f32 %v4246_v51, %v1309_v49  ;;  %3480 = vmatmul.mubr.bf16.gmra.mrb[40].mxu1 %v1374_v41  ;;  %vm1333_vm13 = vcmp.gt.f32.partialorder %v1307_v33, 0.0  ;;  %v3801_v51 = vld [vmem:[#allocation4 + $0x1c0] sm:$0xff]   ;;  %v3811_v49 = vld [vmem:[#allocation4 + $0x210] sm:$0xff]  }
 0x4f5   : > { %vm1336_vm14 = vcmp.gt.f32.partialorder %v1318_v48, 0.0  ;;  %v1352_v53 = vmul.f32 0.01, %v1318_v48  ;;  %v1367_v55 = vsel %vm1335_vm12, %v1315_v42, %v1351_v47  ;;  %3519 = vmatprep.subr.bf16.mxu1 %v3801_v51  ;;  %v3809_v47 = vld [vmem:[#allocation4 + $0x200] sm:$0xff]  }
 0x4f6   : > { %vm1334_vm15 = vcmp.gt.f32.partialorder %v1310_v52, 0.0  ;;  %v1350_v54 = vmul.f32 0.01, %v1310_v52  ;;  %v1365_v57 = vsel %vm1333_vm13, %v1307_v33, %v1349_v50  ;;  %3520 = vmatpush3.bf16.msra.mxu1 %v3801_v51  ;;  %v3807_v33 = vld [vmem:[#allocation4 + $0x1f0] sm:$0xff]   ;;  %3551 = vmatprep.subr.bf16.mxu0 %v3809_v47  ;;  %v3812_v50 = vld [vmem:[#allocation4 + $0x218] sm:$0xff]  }
 0x4f7   : > { %v1368_v56 = vsel %vm1336_vm14, %v1318_v48, %v1352_v53  ;;  %3521 = vmatprep.subr.bf16.mxu1 %v3802_v62  ;;  %v3810_v48 = vld [vmem:[#allocation4 + $0x208] sm:$0xff]  }
 0x4f8   : > { %v1366_v46 = vsel %vm1334_vm15, %v1310_v52, %v1350_v54  ;;  %v1376_v58 = vpack.c.bf16 %v1368_v56, %v1367_v55  ;;  %v3813_v52 = vld [vmem:[#allocation4 + $0x220] sm:$0xff]   ;;  %v3814_v53 = vld [vmem:[#allocation4 + $0x228] sm:$0xff]  }
 0x4f9   : > { %v1375_v59 = vpack.c.bf16 %v1366_v46, %v1365_v57  ;;  %v4287_v54 = vld [vmem:[#allocation6 + $0x6] ss:$0 sm:$0xff] }
 0x4fa   : > { %3522 = vmatpush3.bf16.msra.mxu1 %v3802_v62 }
 0x4fb   : > { %3483 = vmatprep.mubr.bf16.mxu1 %v1375_v59  ;;  %3523 = vmatprep.subr.bf16.mxu1 %v3803_v0 }
 0x4fc   : > { %3484 = vmatmul.mubr.bf16.gmra.mrb[44].mxu1 %v1376_v58 }
 0x4fe   : > { %3524 = vmatpush3.bf16.msra.mxu1 %v3803_v0 }
 0x4ff   : > { %3525 = vmatprep.subr.bf16.mxu1 %v3804_v1 }
 0x502   : > { %3526 = vmatpush3.bf16.msra.mxu1 %v3804_v1 }
 0x503   : > { %3527 = vmatprep.subr.bf16.mxu1 %v3805_v2 }
 0x506   : > { %3528 = vmatpush3.bf16.msra.mxu1 %v3805_v2 }
 0x507   : > { %3529 = vmatprep.subr.bf16.mxu1 %v3806_v3 }
 0x50a   : > { %3530 = vmatpush3.bf16.msra.mxu1 %v3806_v3 }
 0x50b   : > { %3531 = vmatprep.subr.bf16.mxu1 %v3807_v33 }
 0x50e   : > { %3532 = vmatpush3.bf16.msra.mxu1 %v3807_v33 }
 0x50f   : > { %3533 = vmatprep.subr.bf16.mxu1 %v3808_v45 }
 0x512   : > { %3534 = vmatpush3.bf16.msra.mxu1 %v3808_v45 }
 0x5b7   : > { %v3473_v5 = vpop.f32.mrb[32].mxu1 }
 0x5b8   : > { %v1493_v6 = vadd.f32 %v3473_v5, %v3036_v4  ;;  %v1484_v7 = vpop.f32.mrb[33].mxu1 }
 0x5b9   : > { %v1485_v8 = vadd.f32 %v3036_v4, %v1484_v7  ;;  %v3474_v9 = vpop.f32.mrb[34].mxu1 }
 0x5ba   : > { %1549 = vst [vmem:[%s4269_s20 + $0x20] sm:$0xff] %v1493_v6  ;;  %v1496_v10 = vadd.f32 %v3474_v9, %v3036_v4  ;;  %v1487_v63 = vpop.f32.mrb[35].mxu1 }
 0x5bb   : > { %1547 = vst [vmem:[%s4269_s20] sm:$0xff] %v1485_v8  ;;  %v1488_v11 = vadd.f32 %v3036_v4, %v1487_v63 }
 0x5bc   : > { %1550 = vst [vmem:[%s4269_s20 + $0x30] sm:$0xff] %v1496_v10  ;;  %v1564_v12 = vpack.c.bf16 %v1496_v10, %v1493_v6 }
 0x5bd   : > { %1548 = vst [vmem:[%s4269_s20 + $0x10] sm:$0xff] %v1488_v11  ;;  %v1563_v13 = vpack.c.bf16 %v1488_v11, %v1485_v8 }
 0x5bf   : > { %v3477_v14 = vpop.f32.mrb[36].mxu1  ;;  %3503 = vmatprep.mubr.bf16.mxu0 %v1563_v13 }
 0x5c0   : > { %v1509_v15 = vadd.f32 %v3477_v14, %v3036_v4  ;;  %v1500_v17 = vpop.f32.mrb[37].mxu1  ;;  %3504 = vmatmul.mubr.bf16.vlgmr.msra.gmra.mrb[48].mxu0 %v1564_v12 }
 0x5c1   : > { %v1501_v18 = vadd.f32 %v3036_v4, %v1500_v17  ;;  %v3478_v19 = vpop.f32.mrb[38].mxu1  ;;  %3552 = vmatpush3.bf16.msra.mxu0 %v3809_v47 }
 0x5c2   : > { %1553 = vst [vmem:[%s4269_s20 + $0x60] sm:$0xff] %v1509_v15  ;;  %v1512_v20 = vadd.f32 %v3478_v19, %v3036_v4  ;;  %v1503_v21 = vpop.f32.mrb[39].mxu1  ;;  %3553 = vmatprep.subr.bf16.mxu0 %v3810_v48 }
 0x5c3   : > { %1551 = vst [vmem:[%s4269_s20 + $0x40] sm:$0xff] %v1501_v18  ;;  %v1504_v22 = vadd.f32 %v3036_v4, %v1503_v21 }
 0x5c4   : > { %1554 = vst [vmem:[%s4269_s20 + $0x70] sm:$0xff] %v1512_v20  ;;  %v1566_v23 = vpack.c.bf16 %v1512_v20, %v1509_v15 }
 0x5c5   : > { %1552 = vst [vmem:[%s4269_s20 + $0x50] sm:$0xff] %v1504_v22  ;;  %v1565_v24 = vpack.c.bf16 %v1504_v22, %v1501_v18  ;;  %3554 = vmatpush3.bf16.msra.mxu0 %v3810_v48 }
 0x5c6   : > { %3555 = vmatprep.subr.bf16.mxu0 %v3811_v49 }
 0x5c7   : > { %v3481_v25 = vpop.f32.mrb[40].mxu1  ;;  %3507 = vmatprep.mubr.bf16.mxu0 %v1565_v24 }
 0x5c8   : > { %v1525_v26 = vadd.f32 %v3481_v25, %v3036_v4  ;;  %v1516_v27 = vpop.f32.mrb[41].mxu1  ;;  %3508 = vmatmul.mubr.bf16.gmra.mrb[52].mxu0 %v1566_v23 }
 0x5c9   : > { %v1517_v16 = vadd.f32 %v3036_v4, %v1516_v27  ;;  %v3482_v28 = vpop.f32.mrb[42].mxu1  ;;  %3556 = vmatpush3.bf16.msra.mxu0 %v3811_v49 }
 0x5ca   : > { %1557 = vst [vmem:[%s4269_s20 + $0xa0] sm:$0xff] %v1525_v26  ;;  %v1528_v29 = vadd.f32 %v3482_v28, %v3036_v4  ;;  %v1519_v30 = vpop.f32.mrb[43].mxu1  ;;  %3557 = vmatprep.subr.bf16.mxu0 %v3812_v50 }
 0x5cb   : > { %1555 = vst [vmem:[%s4269_s20 + $0x80] sm:$0xff] %v1517_v16  ;;  %v1520_v31 = vadd.f32 %v3036_v4, %v1519_v30 }
 0x5cc   : > { %1558 = vst [vmem:[%s4269_s20 + $0xb0] sm:$0xff] %v1528_v29  ;;  %v1568_v32 = vpack.c.bf16 %v1528_v29, %v1525_v26 }
 0x5cd   : > { %1556 = vst [vmem:[%s4269_s20 + $0x90] sm:$0xff] %v1520_v31  ;;  %v1567_v34 = vpack.c.bf16 %v1520_v31, %v1517_v16  ;;  %3558 = vmatpush3.bf16.msra.mxu0 %v3812_v50 }
 0x5ce   : > { %3559 = vmatprep.subr.bf16.mxu0 %v3813_v52 }
 0x5cf   : > { %v3485_v35 = vpop.f32.mrb[44].mxu1  ;;  %3511 = vmatprep.mubr.bf16.mxu0 %v1567_v34 }
 0x5d0   : > { %v1541_v36 = vadd.f32 %v3485_v35, %v3036_v4  ;;  %v1532_v37 = vpop.f32.mrb[45].mxu1  ;;  %3512 = vmatmul.mubr.bf16.gmra.mrb[56].mxu0 %v1568_v32 }
 0x5d1   : > { %v1533_v38 = vadd.f32 %v3036_v4, %v1532_v37  ;;  %v3486_v39 = vpop.f32.mrb[46].mxu1  ;;  %3560 = vmatpush3.bf16.msra.mxu0 %v3813_v52 }
 0x5d2   : > { %1561 = vst [vmem:[%s4269_s20 + $0xe0] sm:$0xff] %v1541_v36  ;;  %v1544_v40 = vadd.f32 %v3486_v39, %v3036_v4  ;;  %v1535_v41 = vpop.f32.mrb[47].mxu1  ;;  %3561 = vmatprep.subr.bf16.mxu0 %v3814_v53 }
 0x5d3   : > { %1559 = vst [vmem:[%s4269_s20 + $0xc0] sm:$0xff] %v1533_v38  ;;  %v1536_v42 = vadd.f32 %v3036_v4, %v1535_v41 }
 0x5d4   : > { %1562 = vst [vmem:[%s4269_s20 + $0xf0] sm:$0xff] %v1544_v40  ;;  %v1570_v43 = vpack.c.bf16 %v1544_v40, %v1541_v36 }
 0x5d5   : > { %1560 = vst [vmem:[%s4269_s20 + $0xd0] sm:$0xff] %v1536_v42  ;;  %v1569_v44 = vpack.c.bf16 %v1536_v42, %v1533_v38  ;;  %3562 = vmatpush3.bf16.msra.mxu0 %v3814_v53 }
 0x5d7   : > { %3515 = vmatprep.mubr.bf16.mxu0 %v1569_v44 }
 0x5d8   : > { %3516 = vmatmul.mubr.bf16.gmra.mrb[60].mxu0 %v1570_v43 }
 0x693   : > { %v3505_v55 = vpop.f32.mrb[48].mxu0 }
 0x694   : > { %v1687_v56 = vadd.f32 %v3505_v55, %v4287_v54  ;;  %v1678_v57 = vpop.f32.mrb[49].mxu0 }
 0x695   : > { %v1679_v46 = vadd.f32 %v4287_v54, %v1678_v57  ;;  %v3506_v58 = vpop.f32.mrb[50].mxu0 }
 0x696   : > { %v1759_v59 = vmul.f32 0.01, %v1687_v56  ;;  %v1690_v60 = vadd.f32 %v3506_v58, %v4287_v54  ;;  %v1681_v61 = vpop.f32.mrb[51].mxu0  ;;  %vm1743_vm0 = vcmp.gt.f32.partialorder %v1687_v56, 0.0 }
 0x697   : > { %v1757_v51 = vmul.f32 0.01, %v1679_v46  ;;  %v1682_v62 = vadd.f32 %v4287_v54, %v1681_v61  ;;  %vm1741_vm1 = vcmp.gt.f32.partialorder %v1679_v46, 0.0 }
 0x698   : > { %vm1744_vm2 = vcmp.gt.f32.partialorder %v1690_v60, 0.0  ;;  %v1760_v0 = vmul.f32 0.01, %v1690_v60  ;;  %v1775_v2 = vsel %vm1743_vm0, %v1687_v56, %v1759_v59 }
 0x699   : > { %vm1742_vm3 = vcmp.gt.f32.partialorder %v1682_v62, 0.0  ;;  %v1758_v1 = vmul.f32 0.01, %v1682_v62  ;;  %v1773_v6 = vsel %vm1741_vm1, %v1679_v46, %v1757_v51 }
 0x69a   : > { %v1776_v3 = vsel %vm1744_vm2, %v1690_v60, %v1760_v0  ;;  %v3816_v0 = vld [vmem:[#allocation4 + $0x238] sm:$0xff]  }
 0x69b   : > { %v1790_v4 = vpack.c.bf16 %v1776_v3, %v1775_v2  ;;  %v3509_v5 = vpop.f32.mrb[52].mxu0  ;;  %v1774_v7 = vsel %vm1742_vm3, %v1682_v62, %v1758_v1  ;;  %v3815_v62 = vld [vmem:[#allocation4 + $0x230] sm:$0xff]   ;;  %v3818_v1 = vld [vmem:[#allocation4 + $0x248] sm:$0xff]   ;;  %v3820_v3 = vld [vmem:[#allocation4 + $0x258] sm:$0xff]  }
 0x69c   : > { %v1703_v8 = vadd.f32 %v3509_v5, %v4287_v54  ;;  %v1694_v9 = vpop.f32.mrb[53].mxu0  ;;  %v1789_v10 = vpack.c.bf16 %v1774_v7, %v1773_v6  ;;  %3563 = vmatprep.subr.bf16.mxu0 %v3815_v62  ;;  %v3819_v2 = vld [vmem:[#allocation4 + $0x250] sm:$0xff]   ;;  %v3822_v5 = vld [vmem:[#allocation4 + $0x268] sm:$0xff]   ;;  %v4305_v6 = vld [vmem:[#allocation6 + $0x7] ss:$0 sm:$0xff] }
 0x69d   : > { %v1695_v63 = vadd.f32 %v4287_v54, %v1694_v9  ;;  %v3510_v11 = vpop.f32.mrb[54].mxu0  ;;  %3564 = vmatpush3.bf16.msra.mxu0 %v3815_v62 }
 0x69e   : > { %v1763_v12 = vmul.f32 0.01, %v1703_v8  ;;  %v1706_v13 = vadd.f32 %v3510_v11, %v4287_v54  ;;  %v1697_v14 = vpop.f32.mrb[55].mxu0  ;;  %3535 = vmatprep.mubr.bf16.mxu1 %v1789_v10  ;;  %vm1747_vm4 = vcmp.gt.f32.partialorder %v1703_v8, 0.0  ;;  %3565 = vmatprep.subr.bf16.mxu0 %v3816_v0 }
 0x69f   : > { %v1761_v15 = vmul.f32 0.01, %v1695_v63  ;;  %v1698_v17 = vadd.f32 %v4287_v54, %v1697_v14  ;;  %3536 = vmatmul.mubr.bf16.vlgmr.msra.gmra.mrb[48].mxu1 %v1790_v4  ;;  %vm1745_vm5 = vcmp.gt.f32.partialorder %v1695_v63, 0.0  ;;  %v3821_v4 = vld [vmem:[#allocation4 + $0x260] sm:$0xff]  }
 0x6a0   : > { %vm1748_vm6 = vcmp.gt.f32.partialorder %v1706_v13, 0.0  ;;  %v1764_v18 = vmul.f32 0.01, %v1706_v13  ;;  %v1779_v20 = vsel %vm1747_vm4, %v1703_v8, %v1763_v12 }
 0x6a1   : > { %vm1746_vm7 = vcmp.gt.f32.partialorder %v1698_v17, 0.0  ;;  %v1762_v19 = vmul.f32 0.01, %v1698_v17  ;;  %v1777_v23 = vsel %vm1745_vm5, %v1695_v63, %v1761_v15  ;;  %3566 = vmatpush3.bf16.msra.mxu0 %v3816_v0 }
 0x6a2   : > { %v1780_v21 = vsel %vm1748_vm6, %v1706_v13, %v1764_v18 }
 0x6a3   : > { %v3513_v22 = vpop.f32.mrb[56].mxu0  ;;  %v1778_v24 = vsel %vm1746_vm7, %v1698_v17, %v1762_v19  ;;  %v1792_v25 = vpack.c.bf16 %v1780_v21, %v1779_v20 }
 0x6a4   : > { %v1719_v26 = vadd.f32 %v3513_v22, %v4287_v54  ;;  %v1710_v27 = vpop.f32.mrb[57].mxu0  ;;  %v1791_v16 = vpack.c.bf16 %v1778_v24, %v1777_v23 }
 0x6a5   : > { %v1711_v28 = vadd.f32 %v4287_v54, %v1710_v27  ;;  %v3514_v29 = vpop.f32.mrb[58].mxu0 }
 0x6a6   : > { %v1767_v30 = vmul.f32 0.01, %v1719_v26  ;;  %v1722_v31 = vadd.f32 %v3514_v29, %v4287_v54  ;;  %v1713_v32 = vpop.f32.mrb[59].mxu0  ;;  %3539 = vmatprep.mubr.bf16.mxu1 %v1791_v16  ;;  %vm1751_vm8 = vcmp.gt.f32.partialorder %v1719_v26, 0.0 }
 0x6a7   : > { %v1765_v34 = vmul.f32 0.01, %v1711_v28  ;;  %v1714_v35 = vadd.f32 %v4287_v54, %v1713_v32  ;;  %3540 = vmatmul.mubr.bf16.gmra.mrb[52].mxu1 %v1792_v25  ;;  %vm1749_vm9 = vcmp.gt.f32.partialorder %v1711_v28, 0.0 }
 0x6a8   : > { %vm1752_vm10 = vcmp.gt.f32.partialorder %v1722_v31, 0.0  ;;  %v1768_v36 = vmul.f32 0.01, %v1722_v31  ;;  %v1783_v38 = vsel %vm1751_vm8, %v1719_v26, %v1767_v30 }
 0x6a9   : > { %vm1750_vm11 = vcmp.gt.f32.partialorder %v1714_v35, 0.0  ;;  %v1766_v37 = vmul.f32 0.01, %v1714_v35  ;;  %v1781_v41 = vsel %vm1749_vm9, %v1711_v28, %v1765_v34 }
 0x6aa   : > { %v1784_v39 = vsel %vm1752_vm10, %v1722_v31, %v1768_v36 }
 0x6ab   : > { %v3517_v40 = vpop.f32.mrb[60].mxu0  ;;  %v1782_v42 = vsel %vm1750_vm11, %v1714_v35, %v1766_v37  ;;  %v1794_v43 = vpack.c.bf16 %v1784_v39, %v1783_v38 }
 0x6ac   : > { %v1735_v44 = vadd.f32 %v3517_v40, %v4287_v54  ;;  %v1726_v33 = vpop.f32.mrb[61].mxu0  ;;  %v1793_v45 = vpack.c.bf16 %v1782_v42, %v1781_v41 }
 0x6ad   : > { %v1727_v47 = vadd.f32 %v4287_v54, %v1726_v33  ;;  %v3518_v48 = vpop.f32.mrb[62].mxu0 }
 0x6ae   : > { %v1771_v49 = vmul.f32 0.01, %v1735_v44  ;;  %v1738_v50 = vadd.f32 %v3518_v48, %v4287_v54  ;;  %v1729_v52 = vpop.f32.mrb[63].mxu0  ;;  %3543 = vmatprep.mubr.bf16.mxu1 %v1793_v45  ;;  %vm1755_vm12 = vcmp.gt.f32.partialorder %v1735_v44, 0.0 }
 0x6af   : > { %v1769_v53 = vmul.f32 0.01, %v1727_v47  ;;  %v1730_v55 = vadd.f32 %v4287_v54, %v1729_v52  ;;  %3544 = vmatmul.mubr.bf16.gmra.mrb[56].mxu1 %v1794_v43  ;;  %vm1753_vm13 = vcmp.gt.f32.partialorder %v1727_v47, 0.0  ;;  %v3817_v54 = vld [vmem:[#allocation4 + $0x240] sm:$0xff]  }
 0x6b0   : > { %vm1756_vm14 = vcmp.gt.f32.partialorder %v1738_v50, 0.0  ;;  %v1772_v56 = vmul.f32 0.01, %v1738_v50  ;;  %v1787_v46 = vsel %vm1755_vm12, %v1735_v44, %v1771_v49  ;;  %3583 = vmatprep.subr.bf16.mxu1 %v3817_v54 }
 0x6b1   : > { %vm1754_vm15 = vcmp.gt.f32.partialorder %v1730_v55, 0.0  ;;  %v1770_v57 = vmul.f32 0.01, %v1730_v55  ;;  %v1785_v59 = vsel %vm1753_vm13, %v1727_v47, %v1769_v53  ;;  %3584 = vmatpush3.bf16.msra.mxu1 %v3817_v54 }
 0x6b2   : > { %v1788_v58 = vsel %vm1756_vm14, %v1738_v50, %v1772_v56  ;;  %3585 = vmatprep.subr.bf16.mxu1 %v3818_v1 }
 0x6b3   : > { %v1786_v60 = vsel %vm1754_vm15, %v1730_v55, %v1770_v57  ;;  %v1796_v61 = vpack.c.bf16 %v1788_v58, %v1787_v46 }
 0x6b4   : > { %v1795_v51 = vpack.c.bf16 %v1786_v60, %v1785_v59 }
 0x6b5   : > { %3586 = vmatpush3.bf16.msra.mxu1 %v3818_v1 }
 0x6b6   : > { %3547 = vmatprep.mubr.bf16.mxu1 %v1795_v51  ;;  %3587 = vmatprep.subr.bf16.mxu1 %v3819_v2 }
 0x6b7   : > { %3548 = vmatmul.mubr.bf16.gmra.mrb[60].mxu1 %v1796_v61 }
 0x6b9   : > { %3588 = vmatpush3.bf16.msra.mxu1 %v3819_v2 }
 0x6ba   : > { %3589 = vmatprep.subr.bf16.mxu1 %v3820_v3 }
 0x6bd   : > { %3590 = vmatpush3.bf16.msra.mxu1 %v3820_v3 }
 0x6be   : > { %3591 = vmatprep.subr.bf16.mxu1 %v3821_v4 }
 0x6c1   : > { %3592 = vmatpush3.bf16.msra.mxu1 %v3821_v4 }
 0x6c2   : > { %3593 = vmatprep.subr.bf16.mxu1 %v3822_v5 }
 0x6c5   : > { %3594 = vmatpush3.bf16.msra.mxu1 %v3822_v5 }
 0x772   : > { %v3537_v7 = vpop.f32.mrb[48].mxu1 }
 0x773   : > { %v1913_v8 = vadd.f32 %v3537_v7, %v4305_v6  ;;  %v1904_v9 = vpop.f32.mrb[49].mxu1 }
 0x774   : > { %v1905_v10 = vadd.f32 %v4305_v6, %v1904_v9  ;;  %v3538_v63 = vpop.f32.mrb[50].mxu1 }
 0x775   : > { %v1985_v11 = vmul.f32 0.01, %v1913_v8  ;;  %v1916_v12 = vadd.f32 %v3538_v63, %v4305_v6  ;;  %v1907_v13 = vpop.f32.mrb[51].mxu1  ;;  %vm1969_vm0 = vcmp.gt.f32.partialorder %v1913_v8, 0.0 }
 0x776   : > { %v1983_v14 = vmul.f32 0.01, %v1905_v10  ;;  %v1908_v15 = vadd.f32 %v4305_v6, %v1907_v13  ;;  %vm1967_vm1 = vcmp.gt.f32.partialorder %v1905_v10, 0.0 }
 0x777   : > { %vm1970_vm2 = vcmp.gt.f32.partialorder %v1916_v12, 0.0  ;;  %v1986_v17 = vmul.f32 0.01, %v1916_v12  ;;  %v2001_v19 = vsel %vm1969_vm0, %v1913_v8, %v1985_v11 }
 0x778   : > { %vm1968_vm3 = vcmp.gt.f32.partialorder %v1908_v15, 0.0  ;;  %v1984_v18 = vmul.f32 0.01, %v1908_v15  ;;  %v1999_v23 = vsel %vm1967_vm1, %v1905_v10, %v1983_v14 }
 0x779   : > { %v2002_v20 = vsel %vm1970_vm2, %v1916_v12, %v1986_v17  ;;  %v3824_v17 = vld [vmem:[#allocation4 + $0x278] sm:$0xff]  }
 0x77a   : > { %v2016_v21 = vpack.c.bf16 %v2002_v20, %v2001_v19  ;;  %v3541_v22 = vpop.f32.mrb[52].mxu1  ;;  %v2000_v24 = vsel %vm1968_vm3, %v1908_v15, %v1984_v18  ;;  %v3823_v15 = vld [vmem:[#allocation4 + $0x270] sm:$0xff]   ;;  %v3826_v18 = vld [vmem:[#allocation4 + $0x288] sm:$0xff]   ;;  %v3828_v20 = vld [vmem:[#allocation4 + $0x298] sm:$0xff]  }
 0x77b   : > { %v1929_v25 = vadd.f32 %v3541_v22, %v4305_v6  ;;  %v1920_v26 = vpop.f32.mrb[53].mxu1  ;;  %v2015_v27 = vpack.c.bf16 %v2000_v24, %v1999_v23  ;;  %3595 = vmatprep.subr.bf16.mxu1 %v3823_v15  ;;  %v3827_v19 = vld [vmem:[#allocation4 + $0x290] sm:$0xff]   ;;  %v3830_v22 = vld [vmem:[#allocation4 + $0x2a8] sm:$0xff]  }
 0x77c   : > { %v1921_v16 = vadd.f32 %v4305_v6, %v1920_v26  ;;  %v3542_v28 = vpop.f32.mrb[54].mxu1  ;;  %3596 = vmatpush3.bf16.msra.mxu1 %v3823_v15  ;;  %v4323_v23 = vld [vmem:[#allocation6 + $0x8] ss:$0 sm:$0xff] }
 0x77d   : > { %v1989_v29 = vmul.f32 0.01, %v1929_v25  ;;  %v1932_v30 = vadd.f32 %v3542_v28, %v4305_v6  ;;  %v1923_v31 = vpop.f32.mrb[55].mxu1  ;;  %3567 = vmatprep.mubr.bf16.mxu0 %v2015_v27  ;;  %vm1973_vm4 = vcmp.gt.f32.partialorder %v1929_v25, 0.0  ;;  %3597 = vmatprep.subr.bf16.mxu1 %v3824_v17 }
 0x77e   : > { %v1987_v32 = vmul.f32 0.01, %v1921_v16  ;;  %v1924_v34 = vadd.f32 %v4305_v6, %v1923_v31  ;;  %3568 = vmatmul.mubr.bf16.vlgmr.msra.gmra.mrb[64].mxu0 %v2016_v21  ;;  %vm1971_vm5 = vcmp.gt.f32.partialorder %v1921_v16, 0.0  ;;  %v3829_v21 = vld [vmem:[#allocation4 + $0x2a0] sm:$0xff]  }
 0x77f   : > { %vm1974_vm6 = vcmp.gt.f32.partialorder %v1932_v30, 0.0  ;;  %v1990_v35 = vmul.f32 0.01, %v1932_v30  ;;  %v2005_v37 = vsel %vm1973_vm4, %v1929_v25, %v1989_v29 }
 0x780   : > { %vm1972_vm7 = vcmp.gt.f32.partialorder %v1924_v34, 0.0  ;;  %v1988_v36 = vmul.f32 0.01, %v1924_v34  ;;  %v2003_v40 = vsel %vm1971_vm5, %v1921_v16, %v1987_v32  ;;  %3598 = vmatpush3.bf16.msra.mxu1 %v3824_v17 }
 0x781   : > { %v2006_v38 = vsel %vm1974_vm6, %v1932_v30, %v1990_v35 }
 0x782   : > { %v3545_v39 = vpop.f32.mrb[56].mxu1  ;;  %v2004_v41 = vsel %vm1972_vm7, %v1924_v34, %v1988_v36  ;;  %v2018_v42 = vpack.c.bf16 %v2006_v38, %v2005_v37 }
 0x783   : > { %v1945_v43 = vadd.f32 %v3545_v39, %v4305_v6  ;;  %v1936_v44 = vpop.f32.mrb[57].mxu1  ;;  %v2017_v33 = vpack.c.bf16 %v2004_v41, %v2003_v40 }
 0x784   : > { %v1937_v45 = vadd.f32 %v4305_v6, %v1936_v44  ;;  %v3546_v47 = vpop.f32.mrb[58].mxu1 }
 0x785   : > { %v1993_v48 = vmul.f32 0.01, %v1945_v43  ;;  %v1948_v49 = vadd.f32 %v3546_v47, %v4305_v6  ;;  %v1939_v50 = vpop.f32.mrb[59].mxu1  ;;  %3571 = vmatprep.mubr.bf16.mxu0 %v2017_v33  ;;  %vm1977_vm8 = vcmp.gt.f32.partialorder %v1945_v43, 0.0 }
 0x786   : > { %v1991_v52 = vmul.f32 0.01, %v1937_v45  ;;  %v1940_v53 = vadd.f32 %v4305_v6, %v1939_v50  ;;  %3572 = vmatmul.mubr.bf16.gmra.mrb[68].mxu0 %v2018_v42  ;;  %vm1975_vm9 = vcmp.gt.f32.partialorder %v1937_v45, 0.0 }
 0x787   : > { %vm1978_vm10 = vcmp.gt.f32.partialorder %v1948_v49, 0.0  ;;  %v1994_v55 = vmul.f32 0.01, %v1948_v49  ;;  %v2009_v57 = vsel %vm1977_vm8, %v1945_v43, %v1993_v48 }
 0x788   : > { %vm1976_vm11 = vcmp.gt.f32.partialorder %v1940_v53, 0.0  ;;  %v1992_v56 = vmul.f32 0.01, %v1940_v53  ;;  %v2007_v59 = vsel %vm1975_vm9, %v1937_v45, %v1991_v52 }
 0x789   : > { %v2010_v46 = vsel %vm1978_vm10, %v1948_v49, %v1994_v55 }
 0x78a   : > { %v3549_v58 = vpop.f32.mrb[60].mxu1  ;;  %v2008_v60 = vsel %vm1976_vm11, %v1940_v53, %v1992_v56  ;;  %v2020_v61 = vpack.c.bf16 %v2010_v46, %v2009_v57 }
 0x78b   : > { %v1961_v51 = vadd.f32 %v3549_v58, %v4305_v6  ;;  %v1952_v62 = vpop.f32.mrb[61].mxu1  ;;  %v2019_v0 = vpack.c.bf16 %v2008_v60, %v2007_v59 }
 0x78c   : > { %v1953_v54 = vadd.f32 %v4305_v6, %v1952_v62  ;;  %v3550_v1 = vpop.f32.mrb[62].mxu1 }
 0x78d   : > { %v1997_v2 = vmul.f32 0.01, %v1961_v51  ;;  %v1964_v3 = vadd.f32 %v3550_v1, %v4305_v6  ;;  %v1955_v4 = vpop.f32.mrb[63].mxu1  ;;  %3575 = vmatprep.mubr.bf16.mxu0 %v2019_v0  ;;  %vm1981_vm12 = vcmp.gt.f32.partialorder %v1961_v51, 0.0 }
 0x78e   : > { %v1995_v5 = vmul.f32 0.01, %v1953_v54  ;;  %v1956_v7 = vadd.f32 %v4305_v6, %v1955_v4  ;;  %3576 = vmatmul.mubr.bf16.gmra.mrb[72].mxu0 %v2020_v61  ;;  %vm1979_vm13 = vcmp.gt.f32.partialorder %v1953_v54, 0.0  ;;  %v3825_v6 = vld [vmem:[#allocation4 + $0x280] sm:$0xff]  }
 0x78f   : > { %vm1982_vm14 = vcmp.gt.f32.partialorder %v1964_v3, 0.0  ;;  %v1998_v8 = vmul.f32 0.01, %v1964_v3  ;;  %v2013_v10 = vsel %vm1981_vm12, %v1961_v51, %v1997_v2  ;;  %3615 = vmatprep.subr.bf16.mxu0 %v3825_v6 }
 0x790   : > { %vm1980_vm15 = vcmp.gt.f32.partialorder %v1956_v7, 0.0  ;;  %v1996_v9 = vmul.f32 0.01, %v1956_v7  ;;  %v2011_v11 = vsel %vm1979_vm13, %v1953_v54, %v1995_v5  ;;  %3616 = vmatpush3.bf16.msra.mxu0 %v3825_v6 }
 0x791   : > { %v2014_v63 = vsel %vm1982_vm14, %v1964_v3, %v1998_v8  ;;  %3617 = vmatprep.subr.bf16.mxu0 %v3826_v18 }
 0x792   : > { %v2012_v12 = vsel %vm1980_vm15, %v1956_v7, %v1996_v9  ;;  %v2022_v13 = vpack.c.bf16 %v2014_v63, %v2013_v10 }
 0x793   : > { %v2021_v14 = vpack.c.bf16 %v2012_v12, %v2011_v11 }
 0x794   : > { %3618 = vmatpush3.bf16.msra.mxu0 %v3826_v18 }
 0x795   : > { %3579 = vmatprep.mubr.bf16.mxu0 %v2021_v14  ;;  %3619 = vmatprep.subr.bf16.mxu0 %v3827_v19 }
 0x796   : > { %3580 = vmatmul.mubr.bf16.gmra.mrb[76].mxu0 %v2022_v13 }
 0x798   : > { %3620 = vmatpush3.bf16.msra.mxu0 %v3827_v19 }
 0x799   : > { %3621 = vmatprep.subr.bf16.mxu0 %v3828_v20 }
 0x79c   : > { %3622 = vmatpush3.bf16.msra.mxu0 %v3828_v20 }
 0x79d   : > { %3623 = vmatprep.subr.bf16.mxu0 %v3829_v21 }
 0x7a0   : > { %3624 = vmatpush3.bf16.msra.mxu0 %v3829_v21 }
 0x7a1   : > { %3625 = vmatprep.subr.bf16.mxu0 %v3830_v22 }
 0x7a4   : > { %3626 = vmatpush3.bf16.msra.mxu0 %v3830_v22 }
 0x851   : > { %v3569_v24 = vpop.f32.mrb[64].mxu0 }
 0x852   : > { %v2139_v25 = vadd.f32 %v3569_v24, %v4323_v23  ;;  %v2130_v26 = vpop.f32.mrb[65].mxu0 }
 0x853   : > { %v2131_v27 = vadd.f32 %v4323_v23, %v2130_v26  ;;  %v3570_v16 = vpop.f32.mrb[66].mxu0 }
 0x854   : > { %v2211_v28 = vmul.f32 0.01, %v2139_v25  ;;  %v2142_v29 = vadd.f32 %v3570_v16, %v4323_v23  ;;  %v2133_v30 = vpop.f32.mrb[67].mxu0  ;;  %vm2195_vm0 = vcmp.gt.f32.partialorder %v2139_v25, 0.0 }
 0x855   : > { %v2209_v31 = vmul.f32 0.01, %v2131_v27  ;;  %v2134_v32 = vadd.f32 %v4323_v23, %v2133_v30  ;;  %vm2193_vm1 = vcmp.gt.f32.partialorder %v2131_v27, 0.0 }
 0x856   : > { %vm2196_vm2 = vcmp.gt.f32.partialorder %v2142_v29, 0.0  ;;  %v2212_v34 = vmul.f32 0.01, %v2142_v29  ;;  %v2227_v36 = vsel %vm2195_vm0, %v2139_v25, %v2211_v28 }
 0x857   : > { %vm2194_vm3 = vcmp.gt.f32.partialorder %v2134_v32, 0.0  ;;  %v2210_v35 = vmul.f32 0.01, %v2134_v32  ;;  %v2225_v40 = vsel %vm2193_vm1, %v2131_v27, %v2209_v31 }
 0x858   : > { %v2228_v37 = vsel %vm2196_vm2, %v2142_v29, %v2212_v34  ;;  %v3832_v34 = vld [vmem:[#allocation4 + $0x2b8] sm:$0xff]  }
 0x859   : > { %v2242_v38 = vpack.c.bf16 %v2228_v37, %v2227_v36  ;;  %v3573_v39 = vpop.f32.mrb[68].mxu0  ;;  %v2226_v41 = vsel %vm2194_vm3, %v2134_v32, %v2210_v35  ;;  %v3831_v32 = vld [vmem:[#allocation4 + $0x2b0] sm:$0xff]   ;;  %v3834_v35 = vld [vmem:[#allocation4 + $0x2c8] sm:$0xff]   ;;  %v3836_v37 = vld [vmem:[#allocation4 + $0x2d8] sm:$0xff]  }
 0x85a   : > { %v2155_v42 = vadd.f32 %v3573_v39, %v4323_v23  ;;  %v2146_v43 = vpop.f32.mrb[69].mxu0  ;;  %v2241_v44 = vpack.c.bf16 %v2226_v41, %v2225_v40  ;;  %3627 = vmatprep.subr.bf16.mxu0 %v3831_v32  ;;  %v3835_v36 = vld [vmem:[#allocation4 + $0x2d0] sm:$0xff]   ;;  %v3838_v39 = vld [vmem:[#allocation4 + $0x2e8] sm:$0xff]  }
 0x85b   : > { %v2147_v33 = vadd.f32 %v4323_v23, %v2146_v43  ;;  %v3574_v45 = vpop.f32.mrb[70].mxu0  ;;  %3628 = vmatpush3.bf16.msra.mxu0 %v3831_v32  ;;  %v4341_v40 = vld [vmem:[#allocation6 + $0x9] ss:$0 sm:$0xff] }
 0x85c   : > { %v2215_v47 = vmul.f32 0.01, %v2155_v42  ;;  %v2158_v48 = vadd.f32 %v3574_v45, %v4323_v23  ;;  %v2149_v49 = vpop.f32.mrb[71].mxu0  ;;  %3599 = vmatprep.mubr.bf16.mxu1 %v2241_v44  ;;  %vm2199_vm4 = vcmp.gt.f32.partialorder %v2155_v42, 0.0  ;;  %3629 = vmatprep.subr.bf16.mxu0 %v3832_v34 }
 0x85d   : > { %v2213_v50 = vmul.f32 0.01, %v2147_v33  ;;  %v2150_v52 = vadd.f32 %v4323_v23, %v2149_v49  ;;  %3600 = vmatmul.mubr.bf16.vlgmr.msra.gmra.mrb[64].mxu1 %v2242_v38  ;;  %vm2197_vm5 = vcmp.gt.f32.partialorder %v2147_v33, 0.0  ;;  %v3837_v38 = vld [vmem:[#allocation4 + $0x2e0] sm:$0xff]  }
 0x85e   : > { %vm2200_vm6 = vcmp.gt.f32.partialorder %v2158_v48, 0.0  ;;  %v2216_v53 = vmul.f32 0.01, %v2158_v48  ;;  %v2231_v56 = vsel %vm2199_vm4, %v2155_v42, %v2215_v47 }
 0x85f   : > { %vm2198_vm7 = vcmp.gt.f32.partialorder %v2150_v52, 0.0  ;;  %v2214_v55 = vmul.f32 0.01, %v2150_v52  ;;  %v2229_v58 = vsel %vm2197_vm5, %v2147_v33, %v2213_v50  ;;  %3630 = vmatpush3.bf16.msra.mxu0 %v3832_v34 }
 0x860   : > { %v2232_v57 = vsel %vm2200_vm6, %v2158_v48, %v2216_v53 }
 0x861   : > { %v3577_v46 = vpop.f32.mrb[72].mxu0  ;;  %v2230_v59 = vsel %vm2198_vm7, %v2150_v52, %v2214_v55  ;;  %v2244_v60 = vpack.c.bf16 %v2232_v57, %v2231_v56 }
 0x862   : > { %v2171_v61 = vadd.f32 %v3577_v46, %v4323_v23  ;;  %v2162_v51 = vpop.f32.mrb[73].mxu0  ;;  %v2243_v62 = vpack.c.bf16 %v2230_v59, %v2229_v58 }
 0x863   : > { %v2163_v0 = vadd.f32 %v4323_v23, %v2162_v51  ;;  %v3578_v54 = vpop.f32.mrb[74].mxu0 }
 0x864   : > { %v2219_v1 = vmul.f32 0.01, %v2171_v61  ;;  %v2174_v2 = vadd.f32 %v3578_v54, %v4323_v23  ;;  %v2165_v3 = vpop.f32.mrb[75].mxu0  ;;  %3603 = vmatprep.mubr.bf16.mxu1 %v2243_v62  ;;  %vm2203_vm8 = vcmp.gt.f32.partialorder %v2171_v61, 0.0 }
 0x865   : > { %v2217_v4 = vmul.f32 0.01, %v2163_v0  ;;  %v2166_v5 = vadd.f32 %v4323_v23, %v2165_v3  ;;  %3604 = vmatmul.mubr.bf16.gmra.mrb[68].mxu1 %v2244_v60  ;;  %vm2201_vm9 = vcmp.gt.f32.partialorder %v2163_v0, 0.0 }
 0x866   : > { %vm2204_vm10 = vcmp.gt.f32.partialorder %v2174_v2, 0.0  ;;  %v2220_v7 = vmul.f32 0.01, %v2174_v2  ;;  %v2235_v9 = vsel %vm2203_vm8, %v2171_v61, %v2219_v1 }
 0x867   : > { %vm2202_vm11 = vcmp.gt.f32.partialorder %v2166_v5, 0.0  ;;  %v2218_v8 = vmul.f32 0.01, %v2166_v5  ;;  %v2233_v11 = vsel %vm2201_vm9, %v2163_v0, %v2217_v4 }
 0x868   : > { %v2236_v10 = vsel %vm2204_vm10, %v2174_v2, %v2220_v7 }
 0x869   : > { %v3581_v63 = vpop.f32.mrb[76].mxu0  ;;  %v2234_v12 = vsel %vm2202_vm11, %v2166_v5, %v2218_v8  ;;  %v2246_v13 = vpack.c.bf16 %v2236_v10, %v2235_v9 }
 0x86a   : > { %v2187_v14 = vadd.f32 %v3581_v63, %v4323_v23  ;;  %v2178_v15 = vpop.f32.mrb[77].mxu0  ;;  %v2245_v17 = vpack.c.bf16 %v2234_v12, %v2233_v11 }
 0x86b   : > { %v2179_v6 = vadd.f32 %v4323_v23, %v2178_v15  ;;  %v3582_v18 = vpop.f32.mrb[78].mxu0 }
 0x86c   : > { %v2223_v19 = vmul.f32 0.01, %v2187_v14  ;;  %v2190_v20 = vadd.f32 %v3582_v18, %v4323_v23  ;;  %v2181_v21 = vpop.f32.mrb[79].mxu0  ;;  %3607 = vmatprep.mubr.bf16.mxu1 %v2245_v17  ;;  %vm2207_vm12 = vcmp.gt.f32.partialorder %v2187_v14, 0.0 }
 0x86d   : > { %v2221_v22 = vmul.f32 0.01, %v2179_v6  ;;  %v2182_v24 = vadd.f32 %v4323_v23, %v2181_v21  ;;  %3608 = vmatmul.mubr.bf16.gmra.mrb[72].mxu1 %v2246_v13  ;;  %vm2205_vm13 = vcmp.gt.f32.partialorder %v2179_v6, 0.0  ;;  %v3833_v23 = vld [vmem:[#allocation4 + $0x2c0] sm:$0xff]  }
 0x86e   : > { %vm2208_vm14 = vcmp.gt.f32.partialorder %v2190_v20, 0.0  ;;  %v2224_v25 = vmul.f32 0.01, %v2190_v20  ;;  %v2239_v27 = vsel %vm2207_vm12, %v2187_v14, %v2223_v19  ;;  %3647 = vmatprep.subr.bf16.mxu1 %v3833_v23 }
 0x86f   : > { %vm2206_vm15 = vcmp.gt.f32.partialorder %v2182_v24, 0.0  ;;  %v2222_v26 = vmul.f32 0.01, %v2182_v24  ;;  %v2237_v28 = vsel %vm2205_vm13, %v2179_v6, %v2221_v22  ;;  %3648 = vmatpush3.bf16.msra.mxu1 %v3833_v23 }
 0x870   : > { %v2240_v16 = vsel %vm2208_vm14, %v2190_v20, %v2224_v25  ;;  %3649 = vmatprep.subr.bf16.mxu1 %v3834_v35 }
 0x871   : > { %v2238_v29 = vsel %vm2206_vm15, %v2182_v24, %v2222_v26  ;;  %v2248_v30 = vpack.c.bf16 %v2240_v16, %v2239_v27 }
 0x872   : > { %v2247_v31 = vpack.c.bf16 %v2238_v29, %v2237_v28 }
 0x873   : > { %3650 = vmatpush3.bf16.msra.mxu1 %v3834_v35 }
 0x874   : > { %3611 = vmatprep.mubr.bf16.mxu1 %v2247_v31  ;;  %3651 = vmatprep.subr.bf16.mxu1 %v3835_v36 }
 0x875   : > { %3612 = vmatmul.mubr.bf16.gmra.mrb[76].mxu1 %v2248_v30 }
 0x877   : > { %3652 = vmatpush3.bf16.msra.mxu1 %v3835_v36 }
 0x878   : > { %3653 = vmatprep.subr.bf16.mxu1 %v3836_v37 }
 0x87b   : > { %3654 = vmatpush3.bf16.msra.mxu1 %v3836_v37 }
 0x87c   : > { %3655 = vmatprep.subr.bf16.mxu1 %v3837_v38 }
 0x87f   : > { %3656 = vmatpush3.bf16.msra.mxu1 %v3837_v38 }
 0x880   : > { %3657 = vmatprep.subr.bf16.mxu1 %v3838_v39 }
 0x883   : > { %3658 = vmatpush3.bf16.msra.mxu1 %v3838_v39 }
 0x930   : > { %v3601_v41 = vpop.f32.mrb[64].mxu1 }
 0x931   : > { %v2365_v42 = vadd.f32 %v3601_v41, %v4341_v40  ;;  %v2356_v43 = vpop.f32.mrb[65].mxu1 }
 0x932   : > { %v2357_v44 = vadd.f32 %v4341_v40, %v2356_v43  ;;  %v3602_v33 = vpop.f32.mrb[66].mxu1 }
 0x933   : > { %v2437_v45 = vmul.f32 0.01, %v2365_v42  ;;  %v2368_v47 = vadd.f32 %v3602_v33, %v4341_v40  ;;  %v2359_v48 = vpop.f32.mrb[67].mxu1  ;;  %vm2421_vm0 = vcmp.gt.f32.partialorder %v2365_v42, 0.0 }
 0x934   : > { %v2435_v49 = vmul.f32 0.01, %v2357_v44  ;;  %v2360_v50 = vadd.f32 %v4341_v40, %v2359_v48  ;;  %vm2419_vm1 = vcmp.gt.f32.partialorder %v2357_v44, 0.0 }
 0x935   : > { %vm2422_vm2 = vcmp.gt.f32.partialorder %v2368_v47, 0.0  ;;  %v2438_v52 = vmul.f32 0.01, %v2368_v47  ;;  %v2453_v55 = vsel %vm2421_vm0, %v2365_v42, %v2437_v45 }
 0x936   : > { %vm2420_vm3 = vcmp.gt.f32.partialorder %v2360_v50, 0.0  ;;  %v2436_v53 = vmul.f32 0.01, %v2360_v50  ;;  %v2451_v58 = vsel %vm2419_vm1, %v2357_v44, %v2435_v49 }
 0x937   : > { %v2454_v56 = vsel %vm2422_vm2, %v2368_v47, %v2438_v52  ;;  %v3840_v52 = vld [vmem:[#allocation4 + $0x2f8] sm:$0xff]  }
 0x938   : > { %v2468_v57 = vpack.c.bf16 %v2454_v56, %v2453_v55  ;;  %v3605_v46 = vpop.f32.mrb[68].mxu1  ;;  %v2452_v59 = vsel %vm2420_vm3, %v2360_v50, %v2436_v53  ;;  %v3839_v50 = vld [vmem:[#allocation4 + $0x2f0] sm:$0xff]  }
 0x939   : > { %v2381_v60 = vadd.f32 %v3605_v46, %v4341_v40  ;;  %v2372_v61 = vpop.f32.mrb[69].mxu1  ;;  %v2467_v51 = vpack.c.bf16 %v2452_v59, %v2451_v58  ;;  %3659 = vmatprep.subr.bf16.mxu1 %v3839_v50 }
 0x93a   : > { %v2373_v62 = vadd.f32 %v4341_v40, %v2372_v61  ;;  %v3606_v0 = vpop.f32.mrb[70].mxu1  ;;  %3660 = vmatpush3.bf16.msra.mxu1 %v3839_v50 }
 0x93b   : > { %v2441_v54 = vmul.f32 0.01, %v2381_v60  ;;  %v2384_v1 = vadd.f32 %v3606_v0, %v4341_v40  ;;  %v2375_v2 = vpop.f32.mrb[71].mxu1  ;;  %3631 = vmatprep.mubr.bf16.mxu0 %v2467_v51  ;;  %vm2425_vm4 = vcmp.gt.f32.partialorder %v2381_v60, 0.0  ;;  %3661 = vmatprep.subr.bf16.mxu1 %v3840_v52 }
 0x93c   : > { %v2439_v3 = vmul.f32 0.01, %v2373_v62  ;;  %v2376_v4 = vadd.f32 %v4341_v40, %v2375_v2  ;;  %3632 = vmatmul.mubr.bf16.vlgmr.msra.gmra.mrb[80].mxu0 %v2468_v57  ;;  %vm2423_vm5 = vcmp.gt.f32.partialorder %v2373_v62, 0.0 }
 0x93d   : > { %vm2426_vm6 = vcmp.gt.f32.partialorder %v2384_v1, 0.0  ;;  %v2442_v5 = vmul.f32 0.01, %v2384_v1  ;;  %v2457_v8 = vsel %vm2425_vm4, %v2381_v60, %v2441_v54 }
 0x93e   : > { %vm2424_vm7 = vcmp.gt.f32.partialorder %v2376_v4, 0.0  ;;  %v2440_v7 = vmul.f32 0.01, %v2376_v4  ;;  %v2455_v63 = vsel %vm2423_vm5, %v2373_v62, %v2439_v3  ;;  %3662 = vmatpush3.bf16.msra.mxu1 %v3840_v52 }
 0x93f   : > { %v2458_v9 = vsel %vm2426_vm6, %v2384_v1, %v2442_v5 }
 0x940   : > { %v3609_v10 = vpop.f32.mrb[72].mxu1  ;;  %v2456_v11 = vsel %vm2424_vm7, %v2376_v4, %v2440_v7  ;;  %v2470_v12 = vpack.c.bf16 %v2458_v9, %v2457_v8 }
 0x941   : > { %v2397_v13 = vadd.f32 %v3609_v10, %v4341_v40  ;;  %v2388_v14 = vpop.f32.mrb[73].mxu1  ;;  %v2469_v15 = vpack.c.bf16 %v2456_v11, %v2455_v63 }
 0x942   : > { %v2389_v17 = vadd.f32 %v4341_v40, %v2388_v14  ;;  %v3610_v6 = vpop.f32.mrb[74].mxu1 }
 0x943   : > { %v2445_v18 = vmul.f32 0.01, %v2397_v13  ;;  %v2400_v19 = vadd.f32 %v3610_v6, %v4341_v40  ;;  %v2391_v20 = vpop.f32.mrb[75].mxu1  ;;  %3635 = vmatprep.mubr.bf16.mxu0 %v2469_v15  ;;  %vm2429_vm8 = vcmp.gt.f32.partialorder %v2397_v13, 0.0 }
 0x944   : > { %v2443_v21 = vmul.f32 0.01, %v2389_v17  ;;  %v2392_v22 = vadd.f32 %v4341_v40, %v2391_v20  ;;  %3636 = vmatmul.mubr.bf16.gmra.mrb[84].mxu0 %v2470_v12  ;;  %vm2427_vm9 = vcmp.gt.f32.partialorder %v2389_v17, 0.0 }
 0x945   : > { %vm2430_vm10 = vcmp.gt.f32.partialorder %v2400_v19, 0.0  ;;  %v2446_v24 = vmul.f32 0.01, %v2400_v19  ;;  %v2461_v26 = vsel %vm2429_vm8, %v2397_v13, %v2445_v18 }
 0x946   : > { %vm2428_vm11 = vcmp.gt.f32.partialorder %v2392_v22, 0.0  ;;  %v2444_v25 = vmul.f32 0.01, %v2392_v22  ;;  %v2459_v28 = vsel %vm2427_vm9, %v2389_v17, %v2443_v21 }
 0x947   : > { %v2462_v27 = vsel %vm2430_vm10, %v2400_v19, %v2446_v24 }
 0x948   : > { %v3613_v16 = vpop.f32.mrb[76].mxu1  ;;  %v2460_v29 = vsel %vm2428_vm11, %v2392_v22, %v2444_v25  ;;  %v2472_v30 = vpack.c.bf16 %v2462_v27, %v2461_v26 }
 0x949   : > { %v2413_v31 = vadd.f32 %v3613_v16, %v4341_v40  ;;  %v2404_v32 = vpop.f32.mrb[77].mxu1  ;;  %v2471_v34 = vpack.c.bf16 %v2460_v29, %v2459_v28 }
 0x94a   : > { %v2405_v23 = vadd.f32 %v4341_v40, %v2404_v32  ;;  %v3614_v35 = vpop.f32.mrb[78].mxu1 }
 0x94b   : > { %v2449_v36 = vmul.f32 0.01, %v2413_v31  ;;  %v2416_v37 = vadd.f32 %v3614_v35, %v4341_v40  ;;  %v2407_v38 = vpop.f32.mrb[79].mxu1  ;;  %3639 = vmatprep.mubr.bf16.mxu0 %v2471_v34  ;;  %vm2433_vm12 = vcmp.gt.f32.partialorder %v2413_v31, 0.0 }
 0x94c   : > { %v2447_v39 = vmul.f32 0.01, %v2405_v23  ;;  %v2408_v41 = vadd.f32 %v4341_v40, %v2407_v38  ;;  %3640 = vmatmul.mubr.bf16.gmra.mrb[88].mxu0 %v2472_v30  ;;  %vm2431_vm13 = vcmp.gt.f32.partialorder %v2405_v23, 0.0  ;;  %v4359_v40 = vld [vmem:[#allocation6 + $0xa] ss:$0 sm:$0xff] }
 0x94d   : > { %vm2434_vm14 = vcmp.gt.f32.partialorder %v2416_v37, 0.0  ;;  %v2450_v42 = vmul.f32 0.01, %v2416_v37  ;;  %v2465_v44 = vsel %vm2433_vm12, %v2413_v31, %v2449_v36 }
 0x94e   : > { %vm2432_vm15 = vcmp.gt.f32.partialorder %v2408_v41, 0.0  ;;  %v2448_v43 = vmul.f32 0.01, %v2408_v41  ;;  %v2463_v45 = vsel %vm2431_vm13, %v2405_v23, %v2447_v39 }
 0x94f   : > { %v2466_v33 = vsel %vm2434_vm14, %v2416_v37, %v2450_v42 }
 0x950   : > { %v2464_v47 = vsel %vm2432_vm15, %v2408_v41, %v2448_v43  ;;  %v2474_v48 = vpack.c.bf16 %v2466_v33, %v2465_v44 }
 0x951   : > { %v2473_v49 = vpack.c.bf16 %v2464_v47, %v2463_v45 }
 0x953   : > { %3643 = vmatprep.mubr.bf16.mxu0 %v2473_v49 }
 0x954   : > { %3644 = vmatmul.mubr.bf16.gmra.mrb[92].mxu0 %v2474_v48 }
 0xa0f   : > { %v3633_v53 = vpop.f32.mrb[80].mxu0 }
 0xa10   : > { %v2591_v55 = vadd.f32 %v3633_v53, %v4359_v40  ;;  %v2582_v56 = vpop.f32.mrb[81].mxu0 }
 0xa11   : > { %v2583_v57 = vadd.f32 %v4359_v40, %v2582_v56  ;;  %v3634_v46 = vpop.f32.mrb[82].mxu0 }
 0xa12   : > { %v2663_v58 = vmul.f32 0.01, %v2591_v55  ;;  %v2594_v59 = vadd.f32 %v3634_v46, %v4359_v40  ;;  %v2585_v60 = vpop.f32.mrb[83].mxu0  ;;  %vm2647_vm0 = vcmp.gt.f32.partialorder %v2591_v55, 0.0 }
 0xa13   : > { %v2661_v61 = vmul.f32 0.01, %v2583_v57  ;;  %v2586_v51 = vadd.f32 %v4359_v40, %v2585_v60  ;;  %vm2645_vm1 = vcmp.gt.f32.partialorder %v2583_v57, 0.0 }
 0xa14   : > { %vm2648_vm2 = vcmp.gt.f32.partialorder %v2594_v59, 0.0  ;;  %v2664_v62 = vmul.f32 0.01, %v2594_v59  ;;  %v2679_v54 = vsel %vm2647_vm0, %v2591_v55, %v2663_v58 }
 0xa15   : > { %vm2646_vm3 = vcmp.gt.f32.partialorder %v2586_v51, 0.0  ;;  %v2662_v0 = vmul.f32 0.01, %v2586_v51  ;;  %v2677_v4 = vsel %vm2645_vm1, %v2583_v57, %v2661_v61 }
 0xa16   : > { %v2680_v1 = vsel %vm2648_vm2, %v2594_v59, %v2664_v62 }
 0xa17   : > { %v2694_v2 = vpack.c.bf16 %v2680_v1, %v2679_v54  ;;  %v3637_v3 = vpop.f32.mrb[84].mxu0  ;;  %v2678_v5 = vsel %vm2646_vm3, %v2586_v51, %v2662_v0  ;;  %v3090_v51 = vld [vmem:[#allocation6 + $0xb] ss:$0 sm:$0xff] }
 0xa18   : > { %v2607_v7 = vadd.f32 %v3637_v3, %v4359_v40  ;;  %v2598_v8 = vpop.f32.mrb[85].mxu0  ;;  %v2693_v9 = vpack.c.bf16 %v2678_v5, %v2677_v4 }
 0xa19   : > { %v2599_v10 = vadd.f32 %v4359_v40, %v2598_v8  ;;  %v3638_v63 = vpop.f32.mrb[86].mxu0 }
 0xa1a   : > { %v2667_v11 = vmul.f32 0.01, %v2607_v7  ;;  %v2610_v12 = vadd.f32 %v3638_v63, %v4359_v40  ;;  %v2601_v13 = vpop.f32.mrb[87].mxu0  ;;  %3663 = vmatprep.mubr.bf16.mxu1 %v2693_v9  ;;  %vm2651_vm4 = vcmp.gt.f32.partialorder %v2607_v7, 0.0 }
 0xa1b   : > { %v2665_v14 = vmul.f32 0.01, %v2599_v10  ;;  %v2602_v15 = vadd.f32 %v4359_v40, %v2601_v13  ;;  %3664 = vmatmul.mubr.bf16.vlgmr.msra.gmra.mrb[80].mxu1 %v2694_v2  ;;  %vm2649_vm5 = vcmp.gt.f32.partialorder %v2599_v10, 0.0 }
 0xa1c   : > { %vm2652_vm6 = vcmp.gt.f32.partialorder %v2610_v12, 0.0  ;;  %v2668_v17 = vmul.f32 0.01, %v2610_v12  ;;  %v2683_v18 = vsel %vm2651_vm4, %v2607_v7, %v2667_v11 }
 0xa1d   : > { %vm2650_vm7 = vcmp.gt.f32.partialorder %v2602_v15, 0.0  ;;  %v2666_v6 = vmul.f32 0.01, %v2602_v15  ;;  %v2681_v21 = vsel %vm2649_vm5, %v2599_v10, %v2665_v14 }
 0xa1e   : > { %v2684_v19 = vsel %vm2652_vm6, %v2610_v12, %v2668_v17 }
 0xa1f   : > { %v3641_v20 = vpop.f32.mrb[88].mxu0  ;;  %v2682_v22 = vsel %vm2650_vm7, %v2602_v15, %v2666_v6  ;;  %v2696_v24 = vpack.c.bf16 %v2684_v19, %v2683_v18 }
 0xa20   : > { %v2623_v25 = vadd.f32 %v3641_v20, %v4359_v40  ;;  %v2614_v26 = vpop.f32.mrb[89].mxu0  ;;  %v2695_v27 = vpack.c.bf16 %v2682_v22, %v2681_v21 }
 0xa21   : > { %v2615_v16 = vadd.f32 %v4359_v40, %v2614_v26  ;;  %v3642_v28 = vpop.f32.mrb[90].mxu0 }
 0xa22   : > { %v2671_v29 = vmul.f32 0.01, %v2623_v25  ;;  %v2626_v30 = vadd.f32 %v3642_v28, %v4359_v40  ;;  %v2617_v31 = vpop.f32.mrb[91].mxu0  ;;  %3667 = vmatprep.mubr.bf16.mxu1 %v2695_v27  ;;  %vm2655_vm8 = vcmp.gt.f32.partialorder %v2623_v25, 0.0 }
 0xa23   : > { %v2669_v32 = vmul.f32 0.01, %v2615_v16  ;;  %v2618_v34 = vadd.f32 %v4359_v40, %v2617_v31  ;;  %3668 = vmatmul.mubr.bf16.gmra.mrb[84].mxu1 %v2696_v24  ;;  %vm2653_vm9 = vcmp.gt.f32.partialorder %v2615_v16, 0.0 }
 0xa24   : > { %vm2656_vm10 = vcmp.gt.f32.partialorder %v2626_v30, 0.0  ;;  %v2672_v23 = vmul.f32 0.01, %v2626_v30  ;;  %v2687_v36 = vsel %vm2655_vm8, %v2623_v25, %v2671_v29 }
 0xa25   : > { %vm2654_vm11 = vcmp.gt.f32.partialorder %v2618_v34, 0.0  ;;  %v2670_v35 = vmul.f32 0.01, %v2618_v34  ;;  %v2685_v39 = vsel %vm2653_vm9, %v2615_v16, %v2669_v32 }
 0xa26   : > { %v2688_v37 = vsel %vm2656_vm10, %v2626_v30, %v2672_v23 }
 0xa27   : > { %v3645_v38 = vpop.f32.mrb[92].mxu0  ;;  %v2686_v41 = vsel %vm2654_vm11, %v2618_v34, %v2670_v35  ;;  %v2698_v42 = vpack.c.bf16 %v2688_v37, %v2687_v36 }
 0xa28   : > { %v2639_v43 = vadd.f32 %v3645_v38, %v4359_v40  ;;  %v2630_v44 = vpop.f32.mrb[93].mxu0  ;;  %v2697_v33 = vpack.c.bf16 %v2686_v41, %v2685_v39 }
 0xa29   : > { %v2631_v45 = vadd.f32 %v4359_v40, %v2630_v44  ;;  %v3646_v47 = vpop.f32.mrb[94].mxu0 }
 0xa2a   : > { %v2675_v48 = vmul.f32 0.01, %v2639_v43  ;;  %v2642_v49 = vadd.f32 %v3646_v47, %v4359_v40  ;;  %v2633_v50 = vpop.f32.mrb[95].mxu0  ;;  %3671 = vmatprep.mubr.bf16.mxu1 %v2697_v33  ;;  %vm2659_vm12 = vcmp.gt.f32.partialorder %v2639_v43, 0.0 }
 0xa2b   : > { %v2673_v52 = vmul.f32 0.01, %v2631_v45  ;;  %v2634_v53 = vadd.f32 %v4359_v40, %v2633_v50  ;;  %3672 = vmatmul.mubr.bf16.gmra.mrb[88].mxu1 %v2698_v42  ;;  %vm2657_vm13 = vcmp.gt.f32.partialorder %v2631_v45, 0.0 }
 0xa2c   : > { %vm2660_vm14 = vcmp.gt.f32.partialorder %v2642_v49, 0.0  ;;  %v2676_v55 = vmul.f32 0.01, %v2642_v49  ;;  %v2691_v57 = vsel %vm2659_vm12, %v2639_v43, %v2675_v48 }
 0xa2d   : > { %vm2658_vm15 = vcmp.gt.f32.partialorder %v2634_v53, 0.0  ;;  %v2674_v56 = vmul.f32 0.01, %v2634_v53  ;;  %v2689_v58 = vsel %vm2657_vm13, %v2631_v45, %v2673_v52 }
 0xa2e   : > { %v2692_v46 = vsel %vm2660_vm14, %v2642_v49, %v2676_v55 }
 0xa2f   : > { %v2690_v59 = vsel %vm2658_vm15, %v2634_v53, %v2674_v56  ;;  %v2700_v60 = vpack.c.bf16 %v2692_v46, %v2691_v57 }
 0xa30   : > { %v2699_v61 = vpack.c.bf16 %v2690_v59, %v2689_v58 }
 0xa32   : > { %3675 = vmatprep.mubr.bf16.mxu1 %v2699_v61 }
 0xa33   : > { %3676 = vmatmul.mubr.bf16.gmra.mrb[92].mxu1 %v2700_v60 }
 0xaee   : > { %v3665_v40 = vpop.f32.mrb[80].mxu1 }
 0xaef   : > { %v2817_v62 = vadd.f32 %v3665_v40, %v3090_v51  ;;  %v2808_v0 = vpop.f32.mrb[81].mxu1 }
 0xaf0   : > { %v2809_v54 = vadd.f32 %v3090_v51, %v2808_v0  ;;  %v3666_v1 = vpop.f32.mrb[82].mxu1 }
 0xaf1   : > { %2873 = vst [vmem:[%s4269_s20 + $0x28] sm:$0xff] %v2817_v62  ;;  %v2820_v2 = vadd.f32 %v3666_v1, %v3090_v51  ;;  %v2811_v3 = vpop.f32.mrb[83].mxu1 }
 0xaf2   : > { %2871 = vst [vmem:[%s4269_s20 + $0x8] sm:$0xff] %v2809_v54  ;;  %v2812_v4 = vadd.f32 %v3090_v51, %v2811_v3 }
 0xaf3   : > { %2874 = vst [vmem:[%s4269_s20 + $0x38] sm:$0xff] %v2820_v2 }
 0xaf4   : > { %2872 = vst [vmem:[%s4269_s20 + $0x18] sm:$0xff] %v2812_v4 }
 0xaf6   : > { %v3669_v5 = vpop.f32.mrb[84].mxu1 }
 0xaf7   : > { %v2833_v7 = vadd.f32 %v3669_v5, %v3090_v51  ;;  %v2824_v8 = vpop.f32.mrb[85].mxu1 }
 0xaf8   : > { %v2825_v9 = vadd.f32 %v3090_v51, %v2824_v8  ;;  %v3670_v10 = vpop.f32.mrb[86].mxu1 }
 0xaf9   : > { %2877 = vst [vmem:[%s4269_s20 + $0x68] sm:$0xff] %v2833_v7  ;;  %v2836_v63 = vadd.f32 %v3670_v10, %v3090_v51  ;;  %v2827_v11 = vpop.f32.mrb[87].mxu1 }
 0xafa   : > { %2875 = vst [vmem:[%s4269_s20 + $0x48] sm:$0xff] %v2825_v9  ;;  %v2828_v12 = vadd.f32 %v3090_v51, %v2827_v11 }
 0xafb   : > { %2878 = vst [vmem:[%s4269_s20 + $0x78] sm:$0xff] %v2836_v63 }
 0xafc   : > { %2876 = vst [vmem:[%s4269_s20 + $0x58] sm:$0xff] %v2828_v12 }
 0xafe   : > { %v3673_v13 = vpop.f32.mrb[88].mxu1 }
 0xaff   : > { %v2849_v14 = vadd.f32 %v3673_v13, %v3090_v51  ;;  %v2840_v15 = vpop.f32.mrb[89].mxu1 }
 0xb00   : > { %v2841_v17 = vadd.f32 %v3090_v51, %v2840_v15  ;;  %v3674_v6 = vpop.f32.mrb[90].mxu1 }
 0xb01   : > { %2881 = vst [vmem:[%s4269_s20 + $0xa8] sm:$0xff] %v2849_v14  ;;  %v2852_v18 = vadd.f32 %v3674_v6, %v3090_v51  ;;  %v2843_v19 = vpop.f32.mrb[91].mxu1 }
 0xb02   : > { %2879 = vst [vmem:[%s4269_s20 + $0x88] sm:$0xff] %v2841_v17  ;;  %v2844_v20 = vadd.f32 %v3090_v51, %v2843_v19 }
 0xb03   : > { %2882 = vst [vmem:[%s4269_s20 + $0xb8] sm:$0xff] %v2852_v18 }
 0xb04   : > { %2880 = vst [vmem:[%s4269_s20 + $0x98] sm:$0xff] %v2844_v20 }
 0xb06   : > { %v3677_v21 = vpop.f32.mrb[92].mxu1 }
 0xb07   : > { %v2865_v22 = vadd.f32 %v3677_v21, %v3090_v51  ;;  %v2856_v24 = vpop.f32.mrb[93].mxu1 }
 0xb08   : > { %v2857_v25 = vadd.f32 %v3090_v51, %v2856_v24  ;;  %v3678_v26 = vpop.f32.mrb[94].mxu1 }
 0xb09   : > { %2885 = vst [vmem:[%s4269_s20 + $0xe8] sm:$0xff] %v2865_v22  ;;  %v2868_v27 = vadd.f32 %v3678_v26, %v3090_v51  ;;  %v2859_v16 = vpop.f32.mrb[95].mxu1 }
 0xb0a   : > { %2883 = vst [vmem:[%s4269_s20 + $0xc8] sm:$0xff] %v2857_v25  ;;  %v2860_v28 = vadd.f32 %v3090_v51, %v2859_v16 }
 0xb0b   : > { %2886 = vst [vmem:[%s4269_s20 + $0xf8] sm:$0xff] %v2868_v27 }
 0xb0c   : > { %2884 = vst [vmem:[%s4269_s20 + $0xd8] sm:$0xff] %v2860_v28 }
 0xb0d PF: > { %p14_p6 = scmp.ge.s32.totalorder %s4092_s4, 4   ;;  %s4422_s12 = smov %s3957_s13 }
 0xb0e   : > { %s4423_s13 = smov %s3961_s14  ;;  %s4424_s14 = smov %s4101_s7 }
 0xb0f   : > { %s4425_s15 = smov %s4092_s4  ;;  %16 = sbr.rel (!%p14_p6) target bundleno = 4 (0x4), region = 102 }
 0xb16   :  { %2911 = vsyncpa [#allocation3], 1 }
 0xb17   :  { %2913 = vsyncpa [#allocation3 + $0x1], 1 }
 0xb18   :  { %2914 = vsyncpa [#allocation5], 1 }

</bundles_post_ra>
